<compile_context>
chip_gen: v7x
topology: tpu7x:2x2x1
jax: 0.10.0
libtpu: 0.0.40
codegen_flags: <defaults>
</compile_context>

<pallas_src>
import functools

import jax
import jax.numpy as jnp
from jax.experimental import pallas as pl
from jax.experimental.pallas import tpu as pltpu


def _round_up(x, m):
    return -(-x // m) * m


def _conv_bn_lrelu_kernel(x_ref, xh_ref, w_ref, b_ref, o_ref, col_ref, *,
                          negative_slope):
    """One grid step = one (image, row strip).

    x_ref:   (TH,   Wp+2, Cin_p)  padded-input rows [s*TH, s*TH+TH)       (bf16)
    xh_ref:  (2,    Wp+2, Cin_p)  bottom halo rows  [(s+1)*TH, (s+1)*TH+2)(bf16)
    w_ref:   (3, 3*Cin_p, Cout_p) conv weights with BN scale folded in    (bf16)
    b_ref:   (1, Cout_p)          folded conv+BN bias                     (f32)
    o_ref:   (TH, Wp, Cout_p)     output strip
    col_ref: (TH+2, Wp, 3*Cin_p)  VMEM scratch: kw-im2col band            (bf16)
    """
    TH, Wp, Cout = o_ref.shape
    Cin = x_ref.shape[-1]

    # Build the kw-im2col band once per strip.  Destination lane offsets
    # kw*Cin_p are 128-aligned (Cin padded in the wrapper), so these lower to
    # cheap sublane-shift copies rather than cross-lane permutes/masked stores.
    for kw in range(3):
        col_ref[0:TH, :, kw * Cin:(kw + 1) * Cin] = x_ref[:, kw:kw + Wp, :]
        col_ref[TH:TH + 2, :, kw * Cin:(kw + 1) * Cin] = xh_ref[:, kw:kw + Wp, :]

    # 3x3 conv = 3 MXU matmuls with fat K = 3*Cin_p.  kh taps are free slices
    # along the untiled leading dim; the reshape is a free re-tiling because
    # Wp % 8 == 0.  Accumulator is initialized by the first matmul.
    K = 3 * Cin
    acc = jnp.dot(col_ref[0:TH].reshape(TH * Wp, K), w_ref[0],
                  preferred_element_type=jnp.float32)
    for kh in (1, 2):
        acc += jnp.dot(col_ref[kh:kh + TH].reshape(TH * Wp, K), w_ref[kh],
                       preferred_element_type=jnp.float32)

    # Epilogue in f32 (v5e has no bf16 VPU path): folded bias + LeakyReLU.
    # Output store is lane-dense (Cout_p % 128 == 0).
    y = acc + b_ref[0]
    y = jnp.where(y >= 0, y, negative_slope * y)
    o_ref[...] = y.reshape(TH, Wp, Cout).astype(o_ref.dtype)


def _vmem_budget_and_limit():
    """Derive (working-set budget, vmem_limit_bytes) from the chip generation."""
    cap = 64 * 1024 * 1024
    try:
        info = pltpu.get_tpu_info()
        cap = getattr(info, "vmem_capacity_bytes", cap) or cap
    except Exception:
        pass
    if cap >= 96 * 1024 * 1024:                      # v5e / v6e: 128 MiB physical
        return 40 * 1024 * 1024, 96 * 1024 * 1024
    return 20 * 1024 * 1024, 48 * 1024 * 1024        # v7x: 64 MiB per TensorCore


def _pick_row_block(N, H, Wp, Cin_p, Cout_p, budget_bytes):
    """Largest row-strip height (multiple of 8) whose working set fits the
    budget.  Includes resident weight/bias blocks, halo buffers, im2col
    scratch, double-buffered in/out strips and the live f32 accumulator."""
    K = 3 * Cin_p
    fixed = (2 * 3 * K * Cout_p * 2              # weight block (bf16, resident)
             + 2 * Cout_p * 4                    # bias block
             + 2 * 2 * (Wp + 2) * Cin_p * 2)     # 2-row halo (bf16, 2 bufs)

    def est(th):
        return (fixed
                + 2 * th * (Wp + 2) * Cin_p * 2  # input strip (bf16, 2 bufs)
                + (th + 2) * Wp * K * 2          # im2col scratch (bf16)
                + th * Wp * K * 2                # live kh patch (bf16)
                + 2 * th * Wp * Cout_p * 4       # output strip (2 bufs)
                + 2 * th * Wp * Cout_p * 4)      # accumulator + epilogue temps

    h8 = _round_up(H, 8)
    cands = sorted({min(h8, c) for c in (512, 256, 128, 96, 64, 48, 32, 24, 16, 8)},
                   reverse=True)
    th = 8
    for c in cands:
        if est(c) <= budget_bytes:
            th = c
            break
    # Keep at least 2 grid units so both v7x TensorCores receive work.
    while N * (-(-H // th)) < 2 and th > 8:
        th = max(8, (th // 2 + 7) // 8 * 8)
    return th


def conv_bn_relu_nhwc(x_nhwc, conv_w, conv_b, bn_gamma, bn_beta, bn_mean, bn_var,
                      *, eps=1e-5, negative_slope=0.01, row_block=None,
                      out_dtype=jnp.float32, vmem_limit_bytes=None):
    """Fused Conv3x3(s=1,p=1) + BN(eval) + LeakyReLU on NHWC input.

    x_nhwc: (N, H, W, Cin).  conv_w: (Cout, Cin, 3, 3) (PyTorch OIHW).
    """
    N, H, W, Cin = x_nhwc.shape
    Cout = conv_w.shape[0]

    LANE = 128
    Cin_p = _round_up(Cin, LANE)
    Cout_p = _round_up(Cout, LANE)
    Wp = _round_up(W, 8)

    # TODO(synk): BN is applied in inference mode (running stats folded into
    # scale/bias); PyTorch training-mode batch statistics are not reproduced.
    scale = (bn_gamma / jnp.sqrt(bn_var + eps)).astype(jnp.float32)     # (Cout,)
    bias = (bn_beta + (conv_b - bn_mean) * scale).astype(jnp.float32)   # (Cout,)
    bias_p = jnp.pad(bias, (0, Cout_p - Cout)).reshape(1, Cout_p)

    # Fold BN scale into the weights, pad channels, reshape to (kh, kw*Cin, Cout)
    # so the kernel contracts over K = 3*Cin_p on the MXU.
    w = jnp.transpose(conv_w, (2, 3, 1, 0)).astype(jnp.float32) * scale  # (3,3,Cin,Cout)
    w = jnp.pad(w, ((0, 0), (0, 0), (0, Cin_p - Cin), (0, Cout_p - Cout)))
    w = w.reshape(3, 3 * Cin_p, Cout_p).astype(jnp.bfloat16)

    budget, limit = _vmem_budget_and_limit()
    if vmem_limit_bytes is None:
        vmem_limit_bytes = limit
    if row_block is None:
        TH = _pick_row_block(N, H, Wp, Cin_p, Cout_p, budget)
    else:
        TH = max(8, min(_round_up(row_block, 8), _round_up(H, 8)))
    S = -(-H // TH)
    Hpad = S * TH

    # Single fused pad/cast pass over the input: conv zero padding + row/col
    # tail + channel padding + bf16 cast.  No strip materialization.
    # TODO(synk): the spatial zero padding could be folded into the kernel
    # (boundary pl.when) to remove this one remaining XLA pass over the input.
    xp = jnp.pad(x_nhwc.astype(jnp.bfloat16),
                 ((0, 0), (1, 1 + Hpad - H), (1, 1 + Wp - W), (0, Cin_p - Cin)))
    # xp: (N, Hpad+2, Wp+2, Cin_p)

    kernel = functools.partial(_conv_bn_lrelu_kernel,
                               negative_slope=negative_slope)

    out = pl.pallas_call(
        kernel,
        out_shape=jax.ShapeDtypeStruct((N, Hpad, Wp, Cout_p), out_dtype),
        grid_spec=pltpu.PrefetchScalarGridSpec(
            num_scalar_prefetch=0,
            grid=(N, S),
            in_specs=[
                # Main TH-row strip: non-overlapping Blocked window.
                pl.BlockSpec((None, TH, Wp + 2, Cin_p),
                             lambda n, s: (n, s, 0, 0)),
                # 2-row bottom halo: rows [(s+1)*TH, (s+1)*TH+2) via a 2-row
                # block at block index (s+1)*TH/2 (TH is a multiple of 8).
                pl.BlockSpec((None, 2, Wp + 2, Cin_p),
                             lambda n, s: (n, (s + 1) * (TH // 2), 0, 0)),
                pl.BlockSpec((3, 3 * Cin_p, Cout_p), lambda n, s: (0, 0, 0)),
                pl.BlockSpec((1, Cout_p), lambda n, s: (0, 0)),
            ],
            out_specs=pl.BlockSpec((None, TH, Wp, Cout_p),
                                   lambda n, s: (n, s, 0, 0)),
            scratch_shapes=[pltpu.VMEM((TH + 2, Wp, 3 * Cin_p), jnp.bfloat16)],
        ),
        compiler_params=pltpu.CompilerParams(
            dimension_semantics=("parallel", "parallel"),
            vmem_limit_bytes=vmem_limit_bytes),
    )(xp, xp, w, bias_p)

    return out[:, :H, :W, :Cout]


def conv_bn_relu(x_nchw, conv_w, conv_b, bn_gamma, bn_beta, bn_mean, bn_var,
                 *, eps=1e-5, negative_slope=0.01, row_block=None,
                 out_dtype=jnp.float32):
    """PyTorch-layout entry point: x (N, Cin, H, W) -> (N, Cout, H, W).
    For production pipelines, call conv_bn_relu_nhwc end-to-end and skip these
    two layout passes entirely."""
    x = jnp.transpose(x_nchw, (0, 2, 3, 1))                         # NCHW -> NHWC
    y = conv_bn_relu_nhwc(x, conv_w, conv_b, bn_gamma, bn_beta, bn_mean, bn_var,
                          eps=eps, negative_slope=negative_slope,
                          row_block=row_block, out_dtype=out_dtype)
    return jnp.transpose(y, (0, 3, 1, 2))                           # NHWC -> NCHW


def _reference(x_nchw, conv_w, conv_b, bn_gamma, bn_beta, bn_mean, bn_var,
               *, eps=1e-5, negative_slope=0.01):
    y = jax.lax.conv_general_dilated(
        x_nchw, conv_w, window_strides=(1, 1), padding=((1, 1), (1, 1)),
        dimension_numbers=("NCHW", "OIHW", "NCHW"))
    y = y + conv_b[None, :, None, None]
    scale = bn_gamma / jnp.sqrt(bn_var + eps)
    y = (y - bn_mean[None, :, None, None]) * scale[None, :, None, None] \
        + bn_beta[None, :, None, None]
    return jnp.where(y > 0, y, negative_slope * y)


if __name__ == "__main__":
    key = jax.random.PRNGKey(0)
    N, Cin, Cout, H, W = 2, 4, 8, 16, 16

    k1, k2, k3, k4, k5, k6, k7 = jax.random.split(key, 7)
    x = jax.random.normal(k1, (N, Cin, H, W), jnp.float32)
    conv_w = jax.random.normal(k2, (Cout, Cin, 3, 3), jnp.float32) * 0.1
    conv_b = jax.random.normal(k3, (Cout,), jnp.float32) * 0.1
    bn_gamma = 1.0 + 0.1 * jax.random.normal(k4, (Cout,), jnp.float32)
    bn_beta = 0.1 * jax.random.normal(k5, (Cout,), jnp.float32)
    bn_mean = 0.1 * jax.random.normal(k6, (Cout,), jnp.float32)
    bn_var = jnp.abs(jax.random.normal(k7, (Cout,), jnp.float32)) + 0.5

    fn = jax.jit(conv_bn_relu)
    out = fn(x, conv_w, conv_b, bn_gamma, bn_beta, bn_mean, bn_var)
    out = jax.block_until_ready(out)

    ref = _reference(x, conv_w, conv_b, bn_gamma, bn_beta, bn_mean, bn_var)
    assert out.shape == (N, Cout, H, W)
    # bf16 matmul operands (f32 accumulation) vs. full-f32 reference.
    assert jnp.allclose(out, ref, atol=5e-2, rtol=5e-2), \
        float(jnp.max(jnp.abs(out - ref)))

    print("KERNEL_OK")
</pallas_src>

<mosaic_0001>
module attributes {stable_mosaic.version = 11 : i64} {
  func.func @_conv_bn_lrelu_kernel(%arg0: i32, %arg1: i32, %arg2: memref<1x16x18x128xbf16, #tpu.memory_space<vmem>>, %arg3: memref<1x2x18x128xbf16, #tpu.memory_space<vmem>>, %arg4: memref<3x384x128xbf16, #tpu.memory_space<vmem>>, %arg5: memref<1x128xf32, #tpu.memory_space<vmem>>, %arg6: memref<1x16x16x128xf32, #tpu.memory_space<vmem>>, %arg7: memref<18x16x384xbf16, #tpu.memory_space<vmem>>) attributes {dimension_semantics = [#tpu.dimension_semantics<parallel>, #tpu.dimension_semantics<parallel>], iteration_bounds = array<i64: 2, 1>, scalar_prefetch = 0 : i64, scratch_operands = 1 : i64, tpu.core_type = #tpu.core_type<tc>, window_params = [{transform_indices = @transform_0, window_bounds = array<i64: 1, 16, 18, 128>}, {transform_indices = @transform_1, window_bounds = array<i64: 1, 2, 18, 128>}, {pipeline_mode = #tpu.pipeline_mode<synchronous>, transform_indices = @transform_2, window_bounds = array<i64: 3, 384, 128>}, {pipeline_mode = #tpu.pipeline_mode<synchronous>, transform_indices = @transform_3, window_bounds = array<i64: 1, 128>}, {transform_indices = @transform_4, window_bounds = array<i64: 1, 16, 16, 128>}]} {
    %c0 = arith.constant 0 : index
    %c0_0 = arith.constant 0 : index
    %c0_1 = arith.constant 0 : index
    %c0_2 = arith.constant 0 : index
    %0 = vector.load %arg2[%c0, %c0_0, %c0_1, %c0_2] : memref<1x16x18x128xbf16, #tpu.memory_space<vmem>>, vector<1x16x16x128xbf16>
    %1 = vector.shape_cast %0 : vector<1x16x16x128xbf16> to vector<16x16x128xbf16>
    %c0_3 = arith.constant 0 : index
    %c0_4 = arith.constant 0 : index
    %c0_5 = arith.constant 0 : index
    %2 = vector.load %arg7[%c0_3, %c0_4, %c0_5] : memref<18x16x384xbf16, #tpu.memory_space<vmem>>, vector<16x16x128xbf16>
    tpu.vector_store %arg7[%c0_3, %c0_4, %c0_5], %1 {strides = array<i32>} : memref<18x16x384xbf16, #tpu.memory_space<vmem>>, vector<16x16x128xbf16>,
    %c0_6 = arith.constant 0 : index
    %c0_7 = arith.constant 0 : index
    %c0_8 = arith.constant 0 : index
    %c0_9 = arith.constant 0 : index
    %3 = vector.load %arg3[%c0_6, %c0_7, %c0_8, %c0_9] : memref<1x2x18x128xbf16, #tpu.memory_space<vmem>>, vector<1x2x16x128xbf16>
    %4 = vector.shape_cast %3 : vector<1x2x16x128xbf16> to vector<2x16x128xbf16>
    %c16 = arith.constant 16 : index
    %c0_10 = arith.constant 0 : index
    %c0_11 = arith.constant 0 : index
    %5 = vector.load %arg7[%c16, %c0_10, %c0_11] : memref<18x16x384xbf16, #tpu.memory_space<vmem>>, vector<2x16x128xbf16>
    tpu.vector_store %arg7[%c16, %c0_10, %c0_11], %4 {strides = array<i32>} : memref<18x16x384xbf16, #tpu.memory_space<vmem>>, vector<2x16x128xbf16>,
    %c0_12 = arith.constant 0 : index
    %c0_13 = arith.constant 0 : index
    %c1 = arith.constant 1 : index
    %c0_14 = arith.constant 0 : index
    %6 = vector.load %arg2[%c0_12, %c0_13, %c1, %c0_14] : memref<1x16x18x128xbf16, #tpu.memory_space<vmem>>, vector<1x16x16x128xbf16>
    %7 = vector.shape_cast %6 : vector<1x16x16x128xbf16> to vector<16x16x128xbf16>
    %c0_15 = arith.constant 0 : index
    %c0_16 = arith.constant 0 : index
    %c128 = arith.constant 128 : index
    %8 = vector.load %arg7[%c0_15, %c0_16, %c128] : memref<18x16x384xbf16, #tpu.memory_space<vmem>>, vector<16x16x128xbf16>
    tpu.vector_store %arg7[%c0_15, %c0_16, %c128], %7 {strides = array<i32>} : memref<18x16x384xbf16, #tpu.memory_space<vmem>>, vector<16x16x128xbf16>,
    %c0_17 = arith.constant 0 : index
    %c0_18 = arith.constant 0 : index
    %c1_19 = arith.constant 1 : index
    %c0_20 = arith.constant 0 : index
    %9 = vector.load %arg3[%c0_17, %c0_18, %c1_19, %c0_20] : memref<1x2x18x128xbf16, #tpu.memory_space<vmem>>, vector<1x2x16x128xbf16>
    %10 = vector.shape_cast %9 : vector<1x2x16x128xbf16> to vector<2x16x128xbf16>
    %c16_21 = arith.constant 16 : index
    %c0_22 = arith.constant 0 : index
    %c128_23 = arith.constant 128 : index
    %11 = vector.load %arg7[%c16_21, %c0_22, %c128_23] : memref<18x16x384xbf16, #tpu.memory_space<vmem>>, vector<2x16x128xbf16>
    tpu.vector_store %arg7[%c16_21, %c0_22, %c128_23], %10 {strides = array<i32>} : memref<18x16x384xbf16, #tpu.memory_space<vmem>>, vector<2x16x128xbf16>,
    %c0_24 = arith.constant 0 : index
    %c0_25 = arith.constant 0 : index
    %c2 = arith.constant 2 : index
    %c0_26 = arith.constant 0 : index
    %12 = vector.load %arg2[%c0_24, %c0_25, %c2, %c0_26] : memref<1x16x18x128xbf16, #tpu.memory_space<vmem>>, vector<1x16x16x128xbf16>
    %13 = vector.shape_cast %12 : vector<1x16x16x128xbf16> to vector<16x16x128xbf16>
    %c0_27 = arith.constant 0 : index
    %c0_28 = arith.constant 0 : index
    %c256 = arith.constant 256 : index
    %14 = vector.load %arg7[%c0_27, %c0_28, %c256] : memref<18x16x384xbf16, #tpu.memory_space<vmem>>, vector<16x16x128xbf16>
    tpu.vector_store %arg7[%c0_27, %c0_28, %c256], %13 {strides = array<i32>} : memref<18x16x384xbf16, #tpu.memory_space<vmem>>, vector<16x16x128xbf16>,
    %c0_29 = arith.constant 0 : index
    %c0_30 = arith.constant 0 : index
    %c2_31 = arith.constant 2 : index
    %c0_32 = arith.constant 0 : index
    %15 = vector.load %arg3[%c0_29, %c0_30, %c2_31, %c0_32] : memref<1x2x18x128xbf16, #tpu.memory_space<vmem>>, vector<1x2x16x128xbf16>
    %16 = vector.shape_cast %15 : vector<1x2x16x128xbf16> to vector<2x16x128xbf16>
    %c16_33 = arith.constant 16 : index
    %c0_34 = arith.constant 0 : index
    %c256_35 = arith.constant 256 : index
    %17 = vector.load %arg7[%c16_33, %c0_34, %c256_35] : memref<18x16x384xbf16, #tpu.memory_space<vmem>>, vector<2x16x128xbf16>
    tpu.vector_store %arg7[%c16_33, %c0_34, %c256_35], %16 {strides = array<i32>} : memref<18x16x384xbf16, #tpu.memory_space<vmem>>, vector<2x16x128xbf16>,
    %c0_36 = arith.constant 0 : index
    %c0_37 = arith.constant 0 : index
    %c0_38 = arith.constant 0 : index
    %18 = vector.load %arg7[%c0_36, %c0_37, %c0_38] : memref<18x16x384xbf16, #tpu.memory_space<vmem>>, vector<16x16x384xbf16>
    %19 = vector.shape_cast %18 : vector<16x16x384xbf16> to vector<256x384xbf16>
    %c0_39 = arith.constant 0 : index
    %c0_40 = arith.constant 0 : index
    %c0_41 = arith.constant 0 : index
    %20 = vector.load %arg4[%c0_39, %c0_40, %c0_41] : memref<3x384x128xbf16, #tpu.memory_space<vmem>>, vector<1x384x128xbf16>
    %21 = vector.shape_cast %20 : vector<1x384x128xbf16> to vector<384x128xbf16>
    %cst = arith.constant dense<0.000000e+00> : vector<256x128xf32>
    %22 = tpu.matmul %19, %21, %cst {dimension_numbers = #tpu.dot_dimension_numbers<[1], [0], [0], [1], [0, 0, 1, 1], [], []>} : vector<256x384xbf16>, vector<384x128xbf16>, vector<256x128xf32> -> vector<256x128xf32>
    %c1_42 = arith.constant 1 : index
    %c0_43 = arith.constant 0 : index
    %c0_44 = arith.constant 0 : index
    %23 = vector.load %arg7[%c1_42, %c0_43, %c0_44] : memref<18x16x384xbf16, #tpu.memory_space<vmem>>, vector<16x16x384xbf16>
    %24 = vector.shape_cast %23 : vector<16x16x384xbf16> to vector<256x384xbf16>
    %c1_45 = arith.constant 1 : index
    %c0_46 = arith.constant 0 : index
    %c0_47 = arith.constant 0 : index
    %25 = vector.load %arg4[%c1_45, %c0_46, %c0_47] : memref<3x384x128xbf16, #tpu.memory_space<vmem>>, vector<1x384x128xbf16>
    %26 = vector.shape_cast %25 : vector<1x384x128xbf16> to vector<384x128xbf16>
    %cst_48 = arith.constant dense<0.000000e+00> : vector<256x128xf32>
    %27 = tpu.matmul %24, %26, %cst_48 {dimension_numbers = #tpu.dot_dimension_numbers<[1], [0], [0], [1], [0, 0, 1, 1], [], []>} : vector<256x384xbf16>, vector<384x128xbf16>, vector<256x128xf32> -> vector<256x128xf32>
    %28 = arith.addf %22, %27 : vector<256x128xf32>
    %c2_49 = arith.constant 2 : index
    %c0_50 = arith.constant 0 : index
    %c0_51 = arith.constant 0 : index
    %29 = vector.load %arg7[%c2_49, %c0_50, %c0_51] : memref<18x16x384xbf16, #tpu.memory_space<vmem>>, vector<16x16x384xbf16>
    %30 = vector.shape_cast %29 : vector<16x16x384xbf16> to vector<256x384xbf16>
    %c2_52 = arith.constant 2 : index
    %c0_53 = arith.constant 0 : index
    %c0_54 = arith.constant 0 : index
    %31 = vector.load %arg4[%c2_52, %c0_53, %c0_54] : memref<3x384x128xbf16, #tpu.memory_space<vmem>>, vector<1x384x128xbf16>
    %32 = vector.shape_cast %31 : vector<1x384x128xbf16> to vector<384x128xbf16>
    %cst_55 = arith.constant dense<0.000000e+00> : vector<256x128xf32>
    %33 = tpu.matmul %30, %32, %cst_55 {dimension_numbers = #tpu.dot_dimension_numbers<[1], [0], [0], [1], [0, 0, 1, 1], [], []>} : vector<256x384xbf16>, vector<384x128xbf16>, vector<256x128xf32> -> vector<256x128xf32>
    %34 = arith.addf %28, %33 : vector<256x128xf32>
    %c0_56 = arith.constant 0 : index
    %c0_57 = arith.constant 0 : index
    %35 = vector.load %arg5[%c0_56, %c0_57] : memref<1x128xf32, #tpu.memory_space<vmem>>, vector<1x128xf32>
    %36 = vector.shape_cast %35 : vector<1x128xf32> to vector<128xf32>
    %37 = vector.shape_cast %36 : vector<128xf32> to vector<1x128xf32>
    %38 = vector.broadcast %37 : vector<1x128xf32> to vector<256x128xf32>
    %39 = arith.addf %34, %38 : vector<256x128xf32>
    %cst_58 = arith.constant 0.000000e+00 : f32
    %40 = vector.broadcast %cst_58 : f32 to vector<256x128xf32>
    %41 = arith.cmpf oge, %39, %40 : vector<256x128xf32>
    %cst_59 = arith.constant 0.00999999977 : f32
    %42 = vector.broadcast %cst_59 : f32 to vector<256x128xf32>
    %43 = arith.mulf %42, %39 : vector<256x128xf32>
    %44 = arith.select %41, %39, %43 : vector<256x128xi1>, vector<256x128xf32>
    %45 = vector.shape_cast %44 : vector<256x128xf32> to vector<16x16x128xf32>
    %c0_60 = arith.constant 0 : index
    %c0_61 = arith.constant 0 : index
    %c0_62 = arith.constant 0 : index
    %c0_63 = arith.constant 0 : index
    %46 = vector.load %arg6[%c0_60, %c0_61, %c0_62, %c0_63] : memref<1x16x16x128xf32, #tpu.memory_space<vmem>>, vector<1x16x16x128xf32>
    %47 = vector.shape_cast %46 : vector<1x16x16x128xf32> to vector<16x16x128xf32>
    %48 = vector.shape_cast %45 : vector<16x16x128xf32> to vector<1x16x16x128xf32>
    tpu.vector_store %arg6[%c0_60, %c0_61, %c0_62, %c0_63], %48 {strides = array<i32>} : memref<1x16x16x128xf32, #tpu.memory_space<vmem>>, vector<1x16x16x128xf32>,
    return
  }
  func.func @transform_0(%arg0: i32, %arg1: i32) -> (i32, i32, i32, i32) {
    %c0_i32 = arith.constant 0 : i32
    %c0_i32_0 = arith.constant 0 : i32
    %c0_i32_1 = arith.constant 0 : i32
    return %arg0, %arg1, %c0_i32, %c0_i32_0 : i32, i32, i32, i32
  }
  func.func @transform_1(%arg0: i32, %arg1: i32) -> (i32, i32, i32, i32) {
    %c1_i32 = arith.constant 1 : i32
    %0 = arith.addi %arg1, %c1_i32 : i32
    %c8_i32 = arith.constant 8 : i32
    %1 = arith.muli %0, %c8_i32 : i32
    %c0_i32 = arith.constant 0 : i32
    %c0_i32_0 = arith.constant 0 : i32
    %c0_i32_1 = arith.constant 0 : i32
    return %arg0, %1, %c0_i32, %c0_i32_0 : i32, i32, i32, i32
  }
  func.func @transform_2(%arg0: i32, %arg1: i32) -> (i32, i32, i32) {
    %c0_i32 = arith.constant 0 : i32
    %c0_i32_0 = arith.constant 0 : i32
    %c0_i32_1 = arith.constant 0 : i32
    %c0_i32_2 = arith.constant 0 : i32
    return %c0_i32, %c0_i32_0, %c0_i32_1 : i32, i32, i32
  }
  func.func @transform_3(%arg0: i32, %arg1: i32) -> (i32, i32) {
    %c0_i32 = arith.constant 0 : i32
    %c0_i32_0 = arith.constant 0 : i32
    %c0_i32_1 = arith.constant 0 : i32
    return %c0_i32, %c0_i32_0 : i32, i32
  }
  func.func @transform_4(%arg0: i32, %arg1: i32) -> (i32, i32, i32, i32) {
    %c0_i32 = arith.constant 0 : i32
    %c0_i32_0 = arith.constant 0 : i32
    %c0_i32_1 = arith.constant 0 : i32
    return %arg0, %arg1, %c0_i32, %c0_i32_0 : i32, i32, i32, i32
  }
}

</mosaic_0001>

<bundles_post_ra>
// kernel: conv_bn_relu.1
= control target key start
LH: loop header
LB: loop body
LE: loop exit
PB: predicated region body
PF: predicated region fallthrough
CT: control target
= control target key end

     0   :  { %s4472_s15 = smov 0   ;;  %s4474_s16 = smov 0   ;;  %s5507_s0 = inlined_call_operand.vmem [shape: bf16[2,18,18,128], index: 0, kind: input, shape index: {}, may-alias: {0,1}]   ;;  %s5508_s1 = inlined_call_operand.vmem [shape: bf16[2,18,18,128], index: 1, kind: input, shape index: {}, may-alias: {0,1}]   ;;  %s5509_s2 = inlined_call_operand.vmem [shape: bf16[3,384,128], index: 2, kind: input, shape index: {}]   ;;  %s5510_s3 = inlined_call_operand.vmem [shape: f32[1,128], index: 3, kind: input, shape index: {}]   ;;  %s5511_s4 = inlined_call_operand.vmem [shape: f32[2,16,16,128], index: 4, kind: output, shape index: {}]  }
   0x1   :  { %s4476_s17 = smov 0  }
   0x2 LB: > { %s26_s18 = sadd.s32 1, %s4441_s16  ;;  %p3234_p0 = scmp.ge.s32.totalorder %s4445_s17, 1  ;;  %s4445_s17 = sphi %s4476_s17, %s14_s17   ;;  %s4441_s16 = sphi %s4474_s16, %s5515_s16   ;;  %s4437_s15 = sphi %s4472_s15, %s5514_s15  }
   0x3   : > { %p28_p1 = scmp.ge.s32.totalorder %s26_s18, 2  ;;  %p220_p2 = scmp.lt.s32.totalorder %s4445_s17, 3 }
   0x5   : > { %s5517_s18 = smov (%p28_p1, %s26_s18), 0  ;;  %p221_p3 = pnand %p3234_p0, %p220_p2 }
   0x7   : > { %224 = sbr.rel (%p221_p3) target bundleno = 558 (0x22e), region = 36 }
   0xe   : > { %v4258_v0 = vld [vmem:[%s5509_s2 + $0x100] sm:$0xff]   ;;  %p279_p4 = scmp.lt.s32.totalorder %s4437_s15, 1  ;;  %v4261_v3 = vld [vmem:[%s5509_s2 + $0x108] sm:$0xff]   ;;  %v4264_v6 = vld [vmem:[%s5509_s2 + $0x110] sm:$0xff]   ;;  %vm660_vm0 = vsmask.f32 7424 }
   0xf   : > { %v4496_v1 = vld [vmem:[%s5509_s2 + $0x140] sm:$0xff]   ;;  %3503 = vmatprep.subr.bf16.mxu0 %v4258_v0  ;;  %v4511_v4 = vld [vmem:[%s5509_s2 + $0x148] sm:$0xff]   ;;  %v4523_v7 = vld [vmem:[%s5509_s2 + $0x150] sm:$0xff]   ;;  %vm1111_vm1 = vcmask 1046528  }
  0x10   : > { %v4260_v2 = vld [vmem:[%s5509_s2 + $0xc0] sm:$0xff]   ;;  %4055 = vmatprep.subr.bf16.mxu1 %v4496_v1  ;;  %s5519_s15 = smov (!%p279_p4, %s4437_s15), 1  ;;  %v4263_v5 = vld [vmem:[%s5509_s2 + $0xc8] sm:$0xff]   ;;  %v4266_v8 = vld [vmem:[%s5509_s2 + $0xd0] sm:$0xff]  }
  0x11   : > { %3504 = vmatpush3.bf16.msra.mxu0 %v4260_v2  ;;  %4063 = vmatpush3.bf16.msra.mxu1 %v4496_v1  ;;  %v4267_v9 = vld [vmem:[%s5509_s2 + $0x118] sm:$0xff]   ;;  %v4270_v12 = vld [vmem:[%s5509_s2 + $0x120] sm:$0xff]   ;;  %v4273_v15 = vld [vmem:[%s5509_s2 + $0x128] sm:$0xff]   ;;  %s4231_s5 = smul.u32 216, %s5519_s15  ;;  %s3502_s26 = sshll.u32 %s5519_s15, 8 }
  0x12   : > { %3505 = vmatprep.subr.bf16.mxu0 %v4261_v3  ;;  %4056 = vmatprep.subr.bf16.mxu1 %v4511_v4  ;;  %v4536_v10 = vld [vmem:[%s5509_s2 + $0x158] sm:$0xff]   ;;  %v4549_v13 = vld [vmem:[%s5509_s2 + $0x160] sm:$0xff]   ;;  %v4562_v16 = vld [vmem:[%s5509_s2 + $0x168] sm:$0xff]   ;;  %s5382_s28 = scalar_lea.vmem %s5511_s4, %s3502_s26 }
  0x13   : > { %v4269_v11 = vld [vmem:[%s5509_s2 + $0xd8] sm:$0xff]   ;;  %v4272_v14 = vld [vmem:[%s5509_s2 + $0xe0] sm:$0xff]   ;;  %v4275_v17 = vld [vmem:[%s5509_s2 + $0xe8] sm:$0xff]   ;;  %s4586_s20 = scalar_lea.vmem %s5507_s0, %s4231_s5  ;;  %s3501_s6 = sadd.s32 192, %s4231_s5 }
  0x14   : > { %v4276_v18 = vld [vmem:[%s5509_s2 + $0x130] sm:$0xff]   ;;  %v4279_v21 = vld [vmem:[%s5509_s2 + $0x138] sm:$0xff]   ;;  %v4289_v36 = vld [vmem:[%s5509_s2 + $0x40] sm:$0xff]   ;;  %s4737_s12 = scalar_lea.vmem %s5508_s1, %s3501_s6 }
  0x15   : > { %3506 = vmatpush3.bf16.msra.mxu0 %v4263_v5  ;;  %4064 = vmatpush3.bf16.msra.mxu1 %v4511_v4  ;;  %v4576_v19 = vld [vmem:[%s5509_s2 + $0x170] sm:$0xff]   ;;  %v4594_v22 = vld [vmem:[%s5509_s2 + $0x178] sm:$0xff]   ;;  %v4288_v40 = vld [vmem:[%s4586_s20 + $0x80] ss:$0 sps:$4 sm:$0x11]  }
  0x16   : > { %3507 = vmatprep.subr.bf16.mxu0 %v4264_v6  ;;  %4057 = vmatprep.subr.bf16.mxu1 %v4523_v7  ;;  %v4278_v20 = vld [vmem:[%s5509_s2 + $0xf0] sm:$0xff]   ;;  %v4281_v29 = vld [vmem:[%s5509_s2 + $0xf8] sm:$0xff]   ;;  %v4290_v41 = vld [vmem:[%s5509_s2] sm:$0xff]   ;;  %v1143_v45 = vrot.slane %v4288_v40, 1 }
  0x17   : > { %v4282_v23 = vld [vmem:[%s4586_s20 + $0xc] sm:$0xff]   ;;  %v4283_v24 = vld [vmem:[%s4586_s20 + $0x14] ss:$0 sps:$4 sm:$0x11]   ;;  %v4287_v38 = vld [vmem:[%s4586_s20 + $0x78] sm:$0xfe]  }
  0x18   : > { %v674_v25 = vshrl.u32 %v4282_v23, 16  ;;  %v676_v26 = vshll.u32 %v4282_v23, 16  ;;  %v681_v27 = vshll.u32 %v4283_v24, 16  ;;  %v4284_v28 = vld [vmem:[%s4586_s20 + $0x6c] sm:$0xfe]   ;;  %v1142_v43 = vrot.slane %v4287_v38, 1 }
  0x19   : > { %3508 = vmatpush3.bf16.msra.mxu0 %v4266_v8  ;;  %4065 = vmatpush3.bf16.msra.mxu1 %v4523_v7  ;;  %v4285_v30 = vld [vmem:[%s4586_s20 + $0x74] ss:$0 sps:$4 sm:$0x11]   ;;  %v1139_v33 = vrot.slane %v4284_v28, 1  ;;  %v4608_v34 = vld [vmem:[%s4586_s20 + $0xc] sm:$0xff]   ;;  %v4293_v44 = vld [vmem:[%s4586_s20 + $0x18] sm:$0xff]  }
  0x1a   : > { %3509 = vmatprep.subr.bf16.mxu0 %v4267_v9  ;;  %4058 = vmatprep.subr.bf16.mxu1 %v4536_v10  ;;  %v678_v31 = vrot.slane %v676_v26, 1  ;;  %v683_v32 = vrot.slane %v681_v27, 1  ;;  %v1140_v35 = vrot.slane %v4285_v30, 1  ;;  %v4291_v46 = vld [vmem:[%s5509_s2 + $0x48] sm:$0xff]   ;;  %v4634_v47 = vsel %vm1111_vm1, %v1142_v43, %v1143_v45  ;;  %v4300_v53 = vld [vmem:[%s5509_s2 + $0x50] sm:$0xff]   ;;  %v4649_v57 = vld [vmem:[%s4586_s20 + $0x18] sm:$0xff]  }
  0x1b   : > { %v686_v48 = vshrl.u32 %v4293_v44, 16  ;;  %v688_v49 = vshll.u32 %v4293_v44, 16  ;;  %v4292_v50 = vld [vmem:[%s5509_s2 + $0x8] sm:$0xff]   ;;  %v4294_v51 = vld [vmem:[%s4586_s20 + $0x20] ss:$0 sps:$4 sm:$0x11]  }
  0x1c   : > { %v679_v37 = vor.u32 %v678_v31, %v674_v25  ;;  %v4616_v39 = vsel %vm1111_vm1, %v1139_v33, %v1140_v35  ;;  %v693_v54 = vshll.u32 %v4294_v51, 16  ;;  %v4295_v55 = vld [vmem:[%s4586_s20 + $0x84] sm:$0xfe]   ;;  %v4296_v56 = vld [vmem:[%s4586_s20 + $0x8c] ss:$0 sps:$4 sm:$0x11]  }
  0x1d   : > { %3510 = vmatpush3.bf16.msra.mxu0 %v4269_v11  ;;  %4066 = vmatpush3.bf16.msra.mxu1 %v4536_v10  ;;  %v690_v52 = vrot.slane %v688_v49, 1  ;;  %v1145_v60 = vrot.slane %v4295_v55, 1  ;;  %v1146_v61 = vrot.slane %v4296_v56, 1  ;;  %v4301_v62 = vld [vmem:[%s5509_s2 + $0x10] sm:$0xff]   ;;  %v4302_v3 = vld [vmem:[%s5509_s2 + $0x58] sm:$0xff]   ;;  %v4304_v5 = vld [vmem:[%s4586_s20 + $0x24] sm:$0xff]  }
  0x1e   : > { %3511 = vmatprep.subr.bf16.mxu0 %v4270_v12  ;;  %4059 = vmatprep.subr.bf16.mxu1 %v4549_v13  ;;  %v4623_v42 = vsel %vm660_vm0, %v679_v37, %v683_v32  ;;  %v695_v59 = vrot.slane %v693_v54, 1  ;;  %v4298_v63 = vld [vmem:[%s4586_s20 + $0x90] sm:$0xfe]   ;;  %v4299_v2 = vld [vmem:[%s4586_s20 + $0x98] ss:$0 sps:$4 sm:$0x11]  }
  0x1f   : > { %3943 = vmatprep.mubr.bf16.mxu1 %v4616_v39  ;;  %1594 = vmatprep.mubr.bf16.mxu0 %v4623_v42  ;;  %v691_v58 = vor.u32 %v690_v52, %v686_v48  ;;  %v1149_v6 = vrot.slane %v4299_v2, 1  ;;  %v4303_v8 = vld [vmem:[%s5509_s2 + $0x18] sm:$0xff]   ;;  %v698_v11 = vshrl.u32 %v4304_v5, 16  ;;  %v700_v12 = vshll.u32 %v4304_v5, 16  ;;  %v4690_v23 = vld [vmem:[%s4586_s20 + $0x24] sm:$0xff]   ;;  %v4315_v35 = vld [vmem:[%s4586_s20 + $0x30] sm:$0xff]  }
  0x20   : > { %v4313_v28 = vld [vmem:[%s5509_s2 + $0x68] sm:$0xff]   ;;  %v710_v37 = vshrl.u32 %v4315_v35, 16  ;;  %v712_v38 = vshll.u32 %v4315_v35, 16  ;;  %v4316_v40 = vld [vmem:[%s4586_s20 + $0x38] ss:$0 sps:$4 sm:$0x11]  }
  0x21   : > { %3512 = vmatpush3.bf16.msra.mxu0 %v4272_v14  ;;  %4067 = vmatpush3.bf16.msra.mxu1 %v4549_v13  ;;  %v4658_v0 = vsel %vm660_vm0, %v691_v58, %v695_v59  ;;  %v4305_v14 = vld [vmem:[%s4586_s20 + $0x2c] ss:$0 sps:$4 sm:$0x11]   ;;  %v4323_v44 = vld [vmem:[%s5509_s2 + $0x30] sm:$0xff]   ;;  %v717_v45 = vshll.u32 %v4316_v40, 16 }
  0x22   : > { %3513 = vmatprep.subr.bf16.mxu0 %v4273_v15  ;;  %4060 = vmatprep.subr.bf16.mxu1 %v4562_v16  ;;  %v4311_v15 = vld [vmem:[%s5509_s2 + $0x60] sm:$0xff]   ;;  %v4314_v32 = vld [vmem:[%s5509_s2 + $0x28] sm:$0xff]   ;;  %v714_v43 = vrot.slane %v712_v38, 1  ;;  %v4318_v48 = vld [vmem:[%s4586_s20 + $0xbc] ss:$0 sps:$4 sm:$0x11]  }
  0x23   : > { %v4732_v49 = vld [vmem:[%s4586_s20 + $0x30] sm:$0xff]   ;;  %v1158_v52 = vrot.slane %v4318_v48, 1  ;;  %v4320_v54 = vld [vmem:[%s4737_s12] sm:$0xfe]   ;;  %v4786_v38 = vld [vmem:[%s4586_s20 + $0x48] sm:$0xff]  }
  0x24   : > { %v4321_v58 = vld [vmem:[%s4737_s12 + $0x8] ss:$0 sps:$4 sm:$0x11]   ;;  %v1214_v59 = vrot.slane %v4320_v54, 1  ;;  %v4340_v48 = vld [vmem:[%s4586_s20 + $0x60] sm:$0xff]  }
  0x25   : > { %3514 = vmatpush3.bf16.msra.mxu0 %v4275_v17  ;;  %4068 = vmatpush3.bf16.msra.mxu1 %v4562_v16  ;;  %v702_v17 = vrot.slane %v700_v12, 1  ;;  %v4329_v12 = vld [vmem:[%s4586_s20 + $0x8] ss:$0 sps:$4 sm:$0x11]  }
  0x26   : > { %3515 = vmatprep.subr.bf16.mxu0 %v4276_v18  ;;  %4061 = vmatprep.subr.bf16.mxu1 %v4576_v19  ;;  %v705_v18 = vshll.u32 %v4305_v14, 16 }
  0x27   : > { %v703_v24 = vor.u32 %v702_v17, %v698_v11  ;;  %v4768_v17 = vld [vmem:[%s4586_s20 + $0x3c] sm:$0xff]  }
  0x28   : > { %v707_v25 = vrot.slane %v705_v18, 1  ;;  %v4331_v18 = vld [vmem:[%s4586_s20] sm:$0xff]  }
  0x29   : > { %3516 = vmatpush3.bf16.msra.mxu0 %v4278_v20  ;;  %4069 = vmatpush3.bf16.msra.mxu1 %v4576_v19  ;;  %v4306_v20 = vld [vmem:[%s4586_s20 + $0x9c] sm:$0xfe]  }
  0x2a   : > { %3517 = vmatprep.subr.bf16.mxu0 %v4279_v21  ;;  %4062 = vmatprep.subr.bf16.mxu1 %v4594_v22  ;;  %v4307_v21 = vld [vmem:[%s4586_s20 + $0xa4] ss:$0 sps:$4 sm:$0x11]   ;;  %v1151_v26 = vrot.slane %v4306_v20, 1  ;;  %v4699_v30 = vsel %vm660_vm0, %v703_v24, %v707_v25 }
  0x2b   : > { %v1152_v27 = vrot.slane %v4307_v21, 1  ;;  %v4332_v20 = vld [vmem:[%s5509_s2 + $0x80] sm:$0xff]  }
  0x2d   : > { %3518 = vmatpush3.bf16.msra.mxu0 %v4281_v29  ;;  %4070 = vmatpush3.bf16.msra.mxu1 %v4594_v22  ;;  %v4309_v29 = vld [vmem:[%s4586_s20 + $0xa8] sm:$0xfe]   ;;  %v4702_v31 = vsel %vm1111_vm1, %v1151_v26, %v1152_v27  ;;  %v4334_v27 = vld [vmem:[%s4586_s20 + $0x50] ss:$0 sps:$4 sm:$0x11]  }
  0x2e   : > { %3911 = vmatprep.subr.bf16.mxu0 %v4496_v1  ;;  %3639 = vmatprep.subr.bf16.mxu1 %v4289_v36  ;;  %v1154_v33 = vrot.slane %v4309_v29, 1  ;;  %v4333_v26 = vld [vmem:[%s4586_s20 + $0x48] sm:$0xff]  }
  0x2f   : > { %v734_v29 = vshrl.u32 %v4333_v26, 16 }
  0x30   : > { %1595 = vmatmul.mubr.bf16.vlgmr.msra.gmra.mrb[0].mxu0 %v4608_v34  ;;  %3944 = vmatmul.mubr.bf16.vlgmr.msra.gmra.mrb[0].mxu1 %v4634_v47 }
  0x31   : > { %3912 = vmatpush3.bf16.msra.mxu0 %v4496_v1  ;;  %3640 = vmatpush3.bf16.msra.mxu1 %v4290_v41  ;;  %v4661_v1 = vsel %vm1111_vm1, %v1145_v60, %v1146_v61  ;;  %v4322_v41 = vld [vmem:[%s5509_s2 + $0x70] sm:$0xff]   ;;  %v4326_v60 = vld [vmem:[%s4586_s20 + $0x3c] sm:$0xff]   ;;  %v1215_v61 = vrot.slane %v4321_v58, 1 }
  0x32   : > { %3913 = vmatprep.subr.bf16.mxu0 %v4511_v4  ;;  %3641 = vmatprep.subr.bf16.mxu1 %v4291_v46  ;;  %v4317_v46 = vld [vmem:[%s4586_s20 + $0xb4] sm:$0xfe]   ;;  %v722_v2 = vshrl.u32 %v4326_v60, 16 }
  0x33   : > { %1602 = vmatprep.mubr.bf16.mxu0 %v4658_v0  ;;  %3947 = vmatprep.mubr.bf16.mxu1 %v4661_v1  ;;  %v1157_v51 = vrot.slane %v4317_v46, 1 }
  0x35   : > { %3914 = vmatpush3.bf16.msra.mxu0 %v4511_v4  ;;  %3642 = vmatpush3.bf16.msra.mxu1 %v4292_v50  ;;  %v1148_v4 = vrot.slane %v4298_v63, 1  ;;  %v719_v50 = vrot.slane %v717_v45, 1  ;;  %v4749_v56 = vsel %vm1111_vm1, %v1157_v51, %v1158_v52  ;;  %v4762_v63 = vsel %vm1111_vm1, %v1214_v59, %v1215_v61  ;;  %v4339_v45 = vld [vmem:[%s5509_s2 + $0x88] sm:$0xff]   ;;  %v4344_v61 = vld [vmem:[%s4586_s20 + $0x74] ss:$0 sps:$4 sm:$0x11]  }
  0x36   : > { %3915 = vmatprep.subr.bf16.mxu0 %v4523_v7  ;;  %3643 = vmatprep.subr.bf16.mxu1 %v4300_v53  ;;  %v4324_v53 = vld [vmem:[%s5509_s2 + $0x78] sm:$0xff]   ;;  %v758_v52 = vshrl.u32 %v4340_v48, 16  ;;  %v4343_v59 = vld [vmem:[%s4586_s20 + $0x6c] sm:$0xff]  }
  0x37   : > { %v4676_v9 = vsel %vm1111_vm1, %v1148_v4, %v1149_v6  ;;  %v4327_v4 = vld [vmem:[%s4586_s20 + $0x44] ss:$0 sps:$4 sm:$0x11]  }
  0x38   : > { %1603 = vmatmul.mubr.bf16.gmra.mrb[4].mxu0 %v4649_v57  ;;  %3948 = vmatmul.mubr.bf16.gmra.mrb[4].mxu1 %v4676_v9  ;;  %v729_v11 = vshll.u32 %v4327_v4, 16  ;;  %v4810_v4 = vld [vmem:[%s4586_s20 + $0x54] sm:$0xff]  }
  0x39   : > { %3644 = vmatpush3.bf16.msra.mxu1 %v4301_v62  ;;  %3916 = vmatpush3.bf16.msra.mxu0 %v4523_v7  ;;  %v4312_v7 = vld [vmem:[%s5509_s2 + $0x20] sm:$0xff]  }
  0x3a   : > { %3645 = vmatprep.subr.bf16.mxu1 %v4302_v3  ;;  %3917 = vmatprep.subr.bf16.mxu0 %v4536_v10  ;;  %v4328_v62 = vld [vmem:[%s4586_s20] sm:$0xff]   ;;  %v724_v3 = vshll.u32 %v4326_v60, 16 }
  0x3b   : > { %1610 = vmatprep.mubr.bf16.mxu0 %v4699_v30  ;;  %3951 = vmatprep.mubr.bf16.mxu1 %v4702_v31  ;;  %v662_v5 = vshrl.u32 %v4328_v62, 16 }
  0x3c   : > { %v726_v6 = vrot.slane %v724_v3, 1  ;;  %v4346_v3 = vld [vmem:[%s5509_s2 + $0x90] sm:$0xff]  }
  0x3d   : > { %3646 = vmatpush3.bf16.msra.mxu1 %v4303_v8  ;;  %3918 = vmatpush3.bf16.msra.mxu0 %v4536_v10  ;;  %v4310_v10 = vld [vmem:[%s4586_s20 + $0xb0] ss:$0 sps:$4 sm:$0x11]   ;;  %v664_v8 = vshll.u32 %v4328_v62, 16 }
  0x3e   : > { %3647 = vmatprep.subr.bf16.mxu1 %v4311_v15  ;;  %3919 = vmatprep.subr.bf16.mxu0 %v4549_v13  ;;  %v1155_v36 = vrot.slane %v4310_v10, 1  ;;  %v727_v14 = vor.u32 %v726_v6, %v722_v2  ;;  %v736_v10 = vshll.u32 %v4333_v26, 16  ;;  %v772_v2 = vshll.u32 %v4343_v59, 16 }
  0x3f   : > { %v666_v15 = vrot.slane %v664_v8, 1  ;;  %v770_v6 = vshrl.u32 %v4343_v59, 16 }
  0x40   : > { %1611 = vmatmul.mubr.bf16.gmra.mrb[8].mxu0 %v4690_v23  ;;  %v738_v35 = vrot.slane %v736_v10, 1  ;;  %v774_v8 = vrot.slane %v772_v2, 1 }
  0x41   : > { %3648 = vmatpush3.bf16.msra.mxu1 %v4312_v7  ;;  %3920 = vmatpush3.bf16.msra.mxu0 %v4549_v13  ;;  %v4717_v13 = vsel %vm1111_vm1, %v1154_v33, %v1155_v36  ;;  %v669_v7 = vshll.u32 %v4329_v12, 16  ;;  %v667_v21 = vor.u32 %v666_v15, %v662_v5  ;;  %v4336_v33 = vld [vmem:[%s4586_s20 + $0x54] sm:$0xff]   ;;  %v4337_v36 = vld [vmem:[%s4586_s20 + $0x5c] ss:$0 sps:$4 sm:$0x11]  }
  0x42   : > { %3649 = vmatprep.subr.bf16.mxu1 %v4313_v28  ;;  %3921 = vmatprep.subr.bf16.mxu0 %v4562_v16  ;;  %v746_v40 = vshrl.u32 %v4336_v33, 16  ;;  %v4347_v5 = vld [vmem:[%s4586_s20 + $0x78] sm:$0xff]   ;;  %v4348_v12 = vld [vmem:[%s4586_s20 + $0x80] ss:$0 sps:$4 sm:$0x11]   ;;  %v775_v15 = vor.u32 %v774_v8, %v770_v6  ;;  %v4361_v8 = vld [vmem:[%s4586_s20 + $0xa8] sm:$0xff]  }
  0x43   : > { %3952 = vmatmul.mubr.bf16.gmra.mrb[8].mxu1 %v4717_v13  ;;  %v671_v25 = vrot.slane %v669_v7, 1  ;;  %v4822_v7 = vld [vmem:[%s4586_s20 + $0x60] sm:$0xff]   ;;  %v789_v26 = vshll.u32 %v4348_v12, 16 }
  0x44   : > { %3955 = vmatprep.mubr.bf16.mxu1 %v4749_v56 }
  0x45   : > { %3650 = vmatpush3.bf16.msra.mxu1 %v4314_v32  ;;  %3922 = vmatpush3.bf16.msra.mxu0 %v4562_v16  ;;  %v715_v16 = vor.u32 %v714_v43, %v710_v37  ;;  %v672_v28 = vsel %vm660_vm0, %v667_v21, %v671_v25  ;;  %v741_v32 = vshll.u32 %v4334_v27, 16  ;;  %v739_v43 = vor.u32 %v738_v35, %v734_v29  ;;  %v4351_v27 = vld [vmem:[%s4586_s20 + $0x8c] ss:$0 sps:$4 sm:$0x11]   ;;  %v4354_v35 = vld [vmem:[%s4586_s20 + $0x90] sm:$0xff]  }
  0x46   : > { %3923 = vmatprep.subr.bf16.mxu0 %v4576_v19  ;;  %3651 = vmatprep.subr.bf16.mxu1 %v4322_v41  ;;  %v748_v41 = vshll.u32 %v4336_v33, 16  ;;  %v791_v29 = vrot.slane %v789_v26, 1  ;;  %v4840_v33 = vld [vmem:[%s4586_s20 + $0x6c] sm:$0xff]  }
  0x47   : > { %v4746_v55 = vsel %vm660_vm0, %v715_v16, %v719_v50  ;;  %v743_v37 = vrot.slane %v741_v32, 1  ;;  %v4360_v32 = vld [vmem:[%s5509_s2 + $0xa0] sm:$0xff]  }
  0x48   : > { %1618 = vmatprep.mubr.bf16.mxu0 %v4746_v55  ;;  %v750_v46 = vrot.slane %v748_v41, 1  ;;  %v4355_v41 = vld [vmem:[%s4586_s20 + $0x98] ss:$0 sps:$4 sm:$0x11]  }
  0x49   : > { %3652 = vmatpush3.bf16.msra.mxu1 %v4323_v44  ;;  %3924 = vmatpush3.bf16.msra.mxu0 %v4576_v19  ;;  %v4325_v19 = vld [vmem:[%s5509_s2 + $0x38] sm:$0xff]   ;;  %v753_v44 = vshll.u32 %v4337_v36, 16  ;;  %v4793_v16 = vsel %vm660_vm0, %v739_v43, %v743_v37  ;;  %v808_v43 = vshll.u32 %v4354_v35, 16 }
  0x4a   : > { %3925 = vmatprep.subr.bf16.mxu0 %v4594_v22  ;;  %3653 = vmatprep.subr.bf16.mxu1 %v4324_v53  ;;  %v751_v51 = vor.u32 %v750_v46, %v746_v40  ;;  %v760_v53 = vshll.u32 %v4340_v48, 16  ;;  %v4855_v48 = vld [vmem:[%s4586_s20 + $0x78] sm:$0xff]  }
  0x4b   : > { %1619 = vmatmul.mubr.bf16.gmra.mrb[12].mxu0 %v4732_v49  ;;  %3956 = vmatmul.mubr.bf16.gmra.mrb[12].mxu1 %v4762_v63  ;;  %v755_v50 = vrot.slane %v753_v44, 1  ;;  %v4367_v44 = vld [vmem:[%s5509_s2 + $0xa8] sm:$0xff]  }
  0x4c   : > { %2060 = vmatprep.mubr.bf16.mxu1 %v672_v28 }
  0x4d   : > { %3654 = vmatpush3.bf16.msra.mxu1 %v4325_v19  ;;  %3926 = vmatpush3.bf16.msra.mxu0 %v4594_v22  ;;  %v731_v22 = vrot.slane %v729_v11, 1  ;;  %v4799_v58 = vsel %vm660_vm0, %v751_v51, %v755_v50  ;;  %v762_v19 = vrot.slane %v760_v53, 1  ;;  %v777_v11 = vshll.u32 %v4344_v61, 16  ;;  %v4870_v61 = vld [vmem:[%s4586_s20 + $0x84] sm:$0xff]  }
  0x4e   : > { %3959 = vmatprep.subr.bf16.mxu1 %v4332_v20  ;;  %v806_v50 = vshrl.u32 %v4354_v35, 16  ;;  %v813_v51 = vshll.u32 %v4355_v41, 16 }
  0x4f   : > { %v4775_v24 = vsel %vm660_vm0, %v727_v14, %v731_v22  ;;  %v763_v62 = vor.u32 %v762_v19, %v758_v52  ;;  %v784_v14 = vshll.u32 %v4347_v5, 16  ;;  %v779_v22 = vrot.slane %v777_v11, 1  ;;  %v4357_v52 = vld [vmem:[%s4586_s20 + $0x9c] sm:$0xff]   ;;  %v4362_v11 = vld [vmem:[%s4586_s20 + $0xb0] ss:$0 sps:$4 sm:$0x11]  }
  0x50   : > { %1626 = vmatprep.mubr.bf16.mxu0 %v4775_v24  ;;  %v815_v59 = vrot.slane %v813_v51, 1 }
  0x51   : > { %v786_v21 = vrot.slane %v784_v14, 1  ;;  %v4828_v25 = vsel %vm660_vm0, %v775_v15, %v779_v22  ;;  %v832_v15 = vshll.u32 %v4361_v8, 16  ;;  %v4885_v22 = vld [vmem:[%s4586_s20 + $0x90] sm:$0xff]  }
  0x53   : > { %1627 = vmatmul.mubr.bf16.gmra.mrb[16].mxu0 %v4768_v17  ;;  %2061 = vmatmul.mubr.bf16.vlgmr.msra.gmra.mrb[16].mxu1 %v4331_v18  ;;  %v4353_v18 = vld [vmem:[%s5509_s2 + $0x98] sm:$0xff]   ;;  %v834_v26 = vrot.slane %v832_v15, 1  ;;  %v4374_v15 = vld [vmem:[%s4586_s20 + $0x20] ss:$0 sps:$4 sm:$0x11]  }
  0x54   : > { %3960 = vmatpush3.bf16.msra.mxu1 %v4332_v20  ;;  %2068 = vmatprep.mubr.bf16.mxu1 %v4623_v42  ;;  %v4341_v42 = vld [vmem:[%s4586_s20 + $0x68] ss:$0 sps:$4 sm:$0x11]   ;;  %v782_v20 = vshrl.u32 %v4347_v5, 16 }
  0x55   : > { %3961 = vmatprep.subr.bf16.mxu1 %v4339_v45  ;;  %1634 = vmatprep.mubr.bf16.mxu0 %v4793_v16  ;;  %v765_v54 = vshll.u32 %v4341_v42, 16  ;;  %v810_v42 = vrot.slane %v808_v43, 1  ;;  %v4394_v43 = vld [vmem:[%s5509_s2 + $0xb8] sm:$0xff]  }
  0x56   : > { %v787_v28 = vor.u32 %v786_v21, %v782_v20  ;;  %v4364_v20 = vld [vmem:[%s4586_s20 + $0xb4] sm:$0xff]  }
  0x57   : > { %v767_v60 = vrot.slane %v765_v54, 1  ;;  %v4375_v54 = vld [vmem:[%s5509_s2 + $0x1c0] sm:$0xff]   ;;  %v811_v19 = vor.u32 %v810_v42, %v806_v50  ;;  %v842_v35 = vshrl.u32 %v4364_v20, 16  ;;  %v4912_v42 = vld [vmem:[%s4586_s20 + $0xa8] sm:$0xff]  }
  0x58   : > { %3962 = vmatpush3.bf16.msra.mxu1 %v4339_v45  ;;  %v4844_v36 = vsel %vm660_vm0, %v787_v28, %v791_v29  ;;  %3775 = vmatprep.subr.bf16.mxu0 %v4375_v54 }
  0x59   : > { %3963 = vmatprep.subr.bf16.mxu1 %v4346_v3  ;;  %v4876_v5 = vsel %vm660_vm0, %v811_v19, %v815_v59 }
  0x5b   : > { %1635 = vmatmul.mubr.bf16.gmra.mrb[20].mxu0 %v4786_v38  ;;  %2069 = vmatmul.mubr.bf16.gmra.mrb[20].mxu1 %v4608_v34  ;;  %v4814_v34 = vsel %vm660_vm0, %v763_v62, %v767_v60  ;;  %v820_v60 = vshll.u32 %v4357_v52, 16  ;;  %v818_v62 = vshrl.u32 %v4357_v52, 16 }
  0x5c   : > { %1642 = vmatprep.mubr.bf16.mxu0 %v4799_v58  ;;  %2076 = vmatprep.mubr.bf16.mxu1 %v4658_v0 }
  0x5d   : > { %3964 = vmatpush3.bf16.msra.mxu1 %v4346_v3  ;;  %v4377_v3 = vld [vmem:[%s5509_s2 + $0xb0] sm:$0xff]   ;;  %v822_v6 = vrot.slane %v820_v60, 1  ;;  %v4923_v60 = vld [vmem:[%s5509_s2 + $0x200] sm:$0xff]  }
  0x5e   : > { %3965 = vmatprep.subr.bf16.mxu1 %v4353_v18 }
  0x5f   : > { %v823_v12 = vor.u32 %v822_v6, %v818_v62  ;;  %v4927_v62 = vld [vmem:[%s4586_s20 + $0xb4] sm:$0xff]   ;;  %v4371_v6 = vld [vmem:[%s4586_s20 + $0xc] sm:$0xfe]  }
  0x61   : > { %3966 = vmatpush3.bf16.msra.mxu1 %v4353_v18  ;;  %v830_v18 = vshrl.u32 %v4361_v8, 16  ;;  %v4939_v8 = vld [vmem:[%s4737_s12] sm:$0xff]  }
  0x62   : > { %3967 = vmatprep.subr.bf16.mxu1 %v4360_v32 }
  0x63   : > { %1643 = vmatmul.mubr.bf16.gmra.mrb[24].mxu0 %v4810_v4  ;;  %2077 = vmatmul.mubr.bf16.gmra.mrb[24].mxu1 %v4649_v57  ;;  %v4350_v57 = vld [vmem:[%s4586_s20 + $0x84] sm:$0xff]   ;;  %v835_v28 = vor.u32 %v834_v26, %v830_v18  ;;  %v4381_v26 = vld [vmem:[%s4586_s20 + $0x2c] ss:$0 sps:$4 sm:$0x11]  }
  0x64   : > { %1650 = vmatprep.mubr.bf16.mxu0 %v4814_v34  ;;  %2084 = vmatprep.mubr.bf16.mxu1 %v4699_v30  ;;  %v796_v10 = vshll.u32 %v4350_v57, 16  ;;  %v794_v37 = vshrl.u32 %v4350_v57, 16  ;;  %v837_v57 = vshll.u32 %v4362_v11, 16  ;;  %v1115_v11 = vrot.slane %v4371_v6, 1  ;;  %v4390_v6 = vld [vmem:[%s4586_s20 + $0x48] sm:$0xfe]  }
  0x65   : > { %3968 = vmatpush3.bf16.msra.mxu1 %v4360_v32  ;;  %v4897_v32 = vld [vmem:[%s4586_s20 + $0x9c] sm:$0xff]  }
  0x66   : > { %v798_v40 = vrot.slane %v796_v10, 1  ;;  %3969 = vmatprep.subr.bf16.mxu1 %v4367_v44  ;;  %v839_v29 = vrot.slane %v837_v57, 1  ;;  %v844_v10 = vshll.u32 %v4364_v20, 16  ;;  %v4380_v20 = vld [vmem:[%s4586_s20 + $0x24] sm:$0xfe]  }
  0x68   : > { %v799_v45 = vor.u32 %v798_v40, %v794_v37  ;;  %v4368_v40 = vld [vmem:[%s4737_s12] sm:$0xff]   ;;  %v846_v41 = vrot.slane %v844_v10, 1 }
  0x69   : > { %3970 = vmatpush3.bf16.msra.mxu1 %v4367_v44  ;;  %v910_v50 = vshll.u32 %v4368_v40, 16  ;;  %v908_v51 = vshrl.u32 %v4368_v40, 16  ;;  %v4383_v40 = vld [vmem:[%s4586_s20 + $0x38] ss:$0 sps:$4 sm:$0x11]  }
  0x6a   : > { %3971 = vmatprep.subr.bf16.mxu1 %v4377_v3 }
  0x6b   : > { %1651 = vmatmul.mubr.bf16.gmra.mrb[28].mxu0 %v4822_v7  ;;  %2085 = vmatmul.mubr.bf16.gmra.mrb[28].mxu1 %v4690_v23  ;;  %v801_v23 = vshll.u32 %v4351_v27, 16  ;;  %v4365_v27 = vld [vmem:[%s4586_s20 + $0xbc] ss:$0 sps:$4 sm:$0x11]  }
  0x6c   : > { %1658 = vmatprep.mubr.bf16.mxu0 %v4828_v25  ;;  %2092 = vmatprep.mubr.bf16.mxu1 %v4746_v55  ;;  %v849_v37 = vshll.u32 %v4365_v27, 16  ;;  %v1119_v27 = vrot.slane %v4374_v15, 1  ;;  %v4397_v15 = vld [vmem:[%s4586_s20 + $0x54] sm:$0xfe]  }
  0x6d   : > { %v803_v46 = vrot.slane %v801_v23, 1  ;;  %3972 = vmatpush3.bf16.msra.mxu1 %v4377_v3  ;;  %v4901_v23 = vsel %vm660_vm0, %v835_v28, %v839_v29  ;;  %v1121_v28 = vrot.slane %v4380_v20, 1  ;;  %v1122_v29 = vrot.slane %v4381_v26, 1  ;;  %v4398_v20 = vld [vmem:[%s4586_s20 + $0x5c] ss:$0 sps:$4 sm:$0x11]  }
  0x6e   : > { %3973 = vmatprep.subr.bf16.mxu1 %v4394_v43  ;;  %v851_v44 = vrot.slane %v849_v37, 1  ;;  %v4382_v37 = vld [vmem:[%s4586_s20 + $0x30] sm:$0xfe]   ;;  %v4387_v26 = vld [vmem:[%s5509_s2 + $0x198] sm:$0xff]  }
  0x6f   : > { %v4859_v53 = vsel %vm660_vm0, %v799_v45, %v803_v46  ;;  %v847_v45 = vor.u32 %v846_v41, %v842_v35  ;;  %v4369_v46 = vld [vmem:[%s4737_s12 + $0x8] ss:$0 sps:$4 sm:$0x11]   ;;  %v4376_v35 = vld [vmem:[%s5509_s2 + $0x180] sm:$0xff]  }
  0x70   : > { %v915_v54 = vshll.u32 %v4369_v46, 16  ;;  %v4378_v41 = vld [vmem:[%s5509_s2 + $0x1c8] sm:$0xff]  }
  0x71   : > { %3974 = vmatpush3.bf16.msra.mxu1 %v4394_v43  ;;  %v4915_v52 = vsel %vm660_vm0, %v847_v45, %v851_v44  ;;  %v4965_v43 = vsel %vm1111_vm1, %v1121_v28, %v1122_v29  ;;  %v4388_v44 = vld [vmem:[%s4586_s20 + $0x3c] sm:$0xfe]   ;;  %v4389_v45 = vld [vmem:[%s4586_s20 + $0x44] ss:$0 sps:$4 sm:$0x11]   ;;  %v4379_v46 = vld [vmem:[%s5509_s2 + $0x188] sm:$0xff]  }
  0x72   : > { %v917_v59 = vrot.slane %v915_v54, 1  ;;  %4007 = vmatprep.subr.bf16.mxu1 %v4923_v60  ;;  %v1127_v54 = vrot.slane %v4388_v44, 1  ;;  %v4392_v28 = vld [vmem:[%s5509_s2 + $0x1e0] sm:$0xff]   ;;  %v1133_v29 = vrot.slane %v4397_v15, 1  ;;  %v4402_v15 = vld [vmem:[%s5509_s2 + $0x1b0] sm:$0xff]  }
  0x73   : > { %1659 = vmatmul.mubr.bf16.gmra.mrb[32].mxu0 %v4840_v33  ;;  %2093 = vmatmul.mubr.bf16.gmra.mrb[32].mxu1 %v4732_v49  ;;  %v4358_v49 = vld [vmem:[%s4586_s20 + $0xa4] ss:$0 sps:$4 sm:$0x11]   ;;  %v4400_v44 = vld [vmem:[%s4586_s20 + $0x68] ss:$0 sps:$4 sm:$0x11]  }
  0x74   : > { %1666 = vmatprep.mubr.bf16.mxu0 %v4844_v36  ;;  %2100 = vmatprep.mubr.bf16.mxu1 %v4775_v24  ;;  %v825_v2 = vshll.u32 %v4358_v49, 16  ;;  %v912_v49 = vrot.slane %v910_v50, 1  ;;  %v1124_v50 = vrot.slane %v4382_v37, 1 }
  0x76   : > { %v827_v14 = vrot.slane %v825_v2, 1  ;;  %v913_v19 = vor.u32 %v912_v49, %v908_v51  ;;  %v4372_v2 = vld [vmem:[%s4586_s20 + $0x14] ss:$0 sps:$4 sm:$0x11]   ;;  %v1125_v51 = vrot.slane %v4383_v40, 1  ;;  %v4393_v40 = vld [vmem:[%s5509_s2 + $0x1a0] sm:$0xff]  }
  0x77   : > { %v4384_v49 = vld [vmem:[%s5509_s2 + $0x1d0] sm:$0xff]  }
  0x78   : > { %v4889_v21 = vsel %vm660_vm0, %v823_v12, %v827_v14  ;;  %v4932_v3 = vsel %vm660_vm0, %v913_v19, %v917_v59  ;;  %v1116_v12 = vrot.slane %v4372_v2, 1  ;;  %v4373_v14 = vld [vmem:[%s4586_s20 + $0x18] sm:$0xfe]   ;;  %v1128_v19 = vrot.slane %v4389_v45, 1  ;;  %v4385_v2 = vld [vmem:[%s5509_s2 + $0x190] sm:$0xff]   ;;  %v4395_v45 = vld [vmem:[%s5509_s2 + $0x1e8] sm:$0xff]  }
  0x79   : > { %v1118_v57 = vrot.slane %v4373_v14, 1  ;;  %v4980_v59 = vsel %vm1111_vm1, %v1124_v50, %v1125_v51  ;;  %v4405_v50 = vld [vmem:[%s4586_s20] sm:$0xfe]   ;;  %v4406_v51 = vld [vmem:[%s4586_s20 + $0x8] ss:$0 sps:$4 sm:$0x11]  }
  0x7a   : > { %v4945_v18 = vsel %vm1111_vm1, %v1115_v11, %v1116_v12  ;;  %v4391_v11 = vld [vmem:[%s4586_s20 + $0x50] ss:$0 sps:$4 sm:$0x11]   ;;  %v4386_v12 = vld [vmem:[%s5509_s2 + $0x1d8] sm:$0xff]   ;;  %v4991_v14 = vsel %vm1111_vm1, %v1127_v54, %v1128_v19  ;;  %v1137_v19 = vrot.slane %v4400_v44, 1 }
  0x7b   : > { %1667 = vmatmul.mubr.bf16.gmra.mrb[36].mxu0 %v4855_v48  ;;  %2101 = vmatmul.mubr.bf16.gmra.mrb[36].mxu1 %v4768_v17  ;;  %v4954_v10 = vsel %vm1111_vm1, %v1118_v57, %v1119_v27  ;;  %v1130_v57 = vrot.slane %v4390_v6, 1  ;;  %v1131_v27 = vrot.slane %v4391_v11, 1  ;;  %v1112_v6 = vrot.slane %v4405_v50, 1 }
  0x7c   : > { %1674 = vmatprep.mubr.bf16.mxu0 %v4859_v53  ;;  %2108 = vmatprep.mubr.bf16.mxu1 %v4793_v16  ;;  %v1113_v11 = vrot.slane %v4406_v51, 1 }
  0x7d   : > { %v5006_v37 = vsel %vm1111_vm1, %v1130_v57, %v1131_v27  ;;  %v4404_v57 = vld [vmem:[%s5509_s2 + $0x1b8] sm:$0xff]  }
  0x7e   : > { %v4420_v27 = vld [vmem:[%s4586_s20 + $0x18] sm:$0xff]  }
  0x83   : > { %1675 = vmatmul.mubr.bf16.gmra.mrb[40].mxu0 %v4870_v61  ;;  %2109 = vmatmul.mubr.bf16.gmra.mrb[40].mxu1 %v4786_v38 }
  0x84   : > { %1682 = vmatprep.mubr.bf16.mxu0 %v4876_v5  ;;  %2116 = vmatprep.mubr.bf16.mxu1 %v4799_v58 }
  0x8b   : > { %1683 = vmatmul.mubr.bf16.gmra.mrb[44].mxu0 %v4885_v22  ;;  %2117 = vmatmul.mubr.bf16.gmra.mrb[44].mxu1 %v4810_v4 }
  0x8c   : > { %1690 = vmatprep.mubr.bf16.mxu0 %v4889_v21  ;;  %2124 = vmatprep.mubr.bf16.mxu1 %v4814_v34 }
  0x93   : > { %1691 = vmatmul.mubr.bf16.gmra.mrb[48].mxu0 %v4897_v32  ;;  %2125 = vmatmul.mubr.bf16.gmra.mrb[48].mxu1 %v4822_v7 }
  0x94   : > { %1698 = vmatprep.mubr.bf16.mxu0 %v4901_v23  ;;  %2132 = vmatprep.mubr.bf16.mxu1 %v4828_v25 }
  0x9b   : > { %1699 = vmatmul.mubr.bf16.gmra.mrb[52].mxu0 %v4912_v42  ;;  %2133 = vmatmul.mubr.bf16.gmra.mrb[52].mxu1 %v4840_v33 }
  0x9c   : > { %1706 = vmatprep.mubr.bf16.mxu0 %v4915_v52  ;;  %2140 = vmatprep.mubr.bf16.mxu1 %v4844_v36 }
  0xa3   : > { %1707 = vmatmul.mubr.bf16.gmra.mrb[56].mxu0 %v4927_v62  ;;  %2141 = vmatmul.mubr.bf16.gmra.mrb[56].mxu1 %v4855_v48 }
  0xa4   : > { %1714 = vmatprep.mubr.bf16.mxu0 %v4932_v3  ;;  %2148 = vmatprep.mubr.bf16.mxu1 %v4859_v53 }
  0xab   : > { %1715 = vmatmul.mubr.bf16.gmra.mrb[60].mxu0 %v4939_v8  ;;  %2149 = vmatmul.mubr.bf16.gmra.mrb[60].mxu1 %v4870_v61 }
  0xac   : > { %3927 = vmatprep.mubr.bf16.mxu0 %v4945_v18  ;;  %2156 = vmatprep.mubr.bf16.mxu1 %v4876_v5 }
  0xb3   : > { %3928 = vmatmul.mubr.bf16.vlgmr.msra.gmra.mrb[64].mxu0 %v4954_v10  ;;  %2157 = vmatmul.mubr.bf16.gmra.mrb[64].mxu1 %v4885_v22 }
  0xb4   : > { %3776 = vmatpush3.bf16.msra.mxu0 %v4376_v35  ;;  %3931 = vmatprep.mubr.bf16.mxu0 %v4965_v43  ;;  %v1134_v35 = vrot.slane %v4398_v20, 1  ;;  %v4403_v20 = vld [vmem:[%s5509_s2 + $0x1f8] sm:$0xff]  }
  0xb5   : > { %3777 = vmatprep.subr.bf16.mxu0 %v4378_v41  ;;  %2164 = vmatprep.mubr.bf16.mxu1 %v4889_v21  ;;  %v4399_v41 = vld [vmem:[%s4586_s20 + $0x60] sm:$0xfe]  }
  0xb6   : > { %v1136_v54 = vrot.slane %v4399_v41, 1 }
  0xb8   : > { %3778 = vmatpush3.bf16.msra.mxu0 %v4379_v46  ;;  %v5017_v46 = vsel %vm1111_vm1, %v1133_v29, %v1134_v35  ;;  %v4421_v29 = vld [vmem:[%s4586_s20 + $0x24] sm:$0xff]  }
  0xb9   : > { %3779 = vmatprep.subr.bf16.mxu0 %v4384_v49  ;;  %v4396_v49 = vld [vmem:[%s5509_s2 + $0x1a8] sm:$0xff]  }
  0xba   : > { %v4412_v35 = vld [vmem:[%s5509_s2 + $0x228] sm:$0xff]  }
  0xbb   : > { %3932 = vmatmul.mubr.bf16.gmra.mrb[68].mxu0 %v4980_v59  ;;  %2165 = vmatmul.mubr.bf16.gmra.mrb[68].mxu1 %v4897_v32 }
  0xbc   : > { %3780 = vmatpush3.bf16.msra.mxu0 %v4385_v2  ;;  %3935 = vmatprep.mubr.bf16.mxu0 %v4991_v14  ;;  %v4401_v2 = vld [vmem:[%s5509_s2 + $0x1f0] sm:$0xff]  }
  0xbd   : > { %3781 = vmatprep.subr.bf16.mxu0 %v4386_v12  ;;  %2172 = vmatprep.mubr.bf16.mxu1 %v4901_v23  ;;  %v5032_v12 = vsel %vm1111_vm1, %v1136_v54, %v1137_v19 }
  0xc0   : > { %3782 = vmatpush3.bf16.msra.mxu0 %v4387_v26  ;;  %v1114_v26 = vsel %vm1111_vm1, %v1112_v6, %v1113_v11 }
  0xc1   : > { %3783 = vmatprep.subr.bf16.mxu0 %v4392_v28  ;;  %v4408_v28 = vld [vmem:[%s5509_s2 + $0x208] sm:$0xff]  }
  0xc3   : > { %3936 = vmatmul.mubr.bf16.gmra.mrb[72].mxu0 %v5006_v37  ;;  %2173 = vmatmul.mubr.bf16.gmra.mrb[72].mxu1 %v4912_v42 }
  0xc4   : > { %3784 = vmatpush3.bf16.msra.mxu0 %v4393_v40  ;;  %3939 = vmatprep.mubr.bf16.mxu0 %v5017_v46  ;;  %v4414_v40 = vld [vmem:[%s5509_s2 + $0x238] sm:$0xff]  }
  0xc5   : > { %3785 = vmatprep.subr.bf16.mxu0 %v4395_v45  ;;  %2180 = vmatprep.mubr.bf16.mxu1 %v4915_v52 }
  0xc8   : > { %3786 = vmatpush3.bf16.msra.mxu0 %v4396_v49 }
  0xc9   : > { %3787 = vmatprep.subr.bf16.mxu0 %v4401_v2 }
  0xcb   : > { %3940 = vmatmul.mubr.bf16.gmra.mrb[76].mxu0 %v5032_v12  ;;  %2181 = vmatmul.mubr.bf16.gmra.mrb[76].mxu1 %v4927_v62 }
  0xcc   : > { %3788 = vmatpush3.bf16.msra.mxu0 %v4402_v15  ;;  %2624 = vmatprep.mubr.bf16.mxu0 %v4658_v0  ;;  %v4409_v0 = vld [vmem:[%s5509_s2 + $0x210] sm:$0xff]  }
  0xcd   : > { %3789 = vmatprep.subr.bf16.mxu0 %v4403_v20  ;;  %3975 = vmatprep.mubr.bf16.mxu1 %v1114_v26 }
  0xd0   : > { %3790 = vmatpush3.bf16.msra.mxu0 %v4404_v57 }
  0xd3   : > { %2625 = vmatmul.mubr.bf16.vlgmr.msra.gmra.mrb[80].mxu0 %v4420_v27  ;;  %3976 = vmatmul.mubr.bf16.vlgmr.msra.gmra.mrb[80].mxu1 %v4945_v18  ;;  %v4422_v18 = vld [vmem:[%s4586_s20 + $0x30] sm:$0xff]  }
  0xd4   : > { %2632 = vmatprep.mubr.bf16.mxu0 %v4699_v30  ;;  %4008 = vmatpush3.bf16.msra.mxu1 %v4923_v60  ;;  %v4410_v30 = vld [vmem:[%s5509_s2 + $0x218] sm:$0xff]   ;;  %v4411_v60 = vld [vmem:[%s5509_s2 + $0x220] sm:$0xff]  }
  0xd5   : > { %3979 = vmatprep.mubr.bf16.mxu1 %v4954_v10  ;;  %4009 = vmatprep.subr.bf16.mxu1 %v4408_v28 }
  0xd8   : > { %4010 = vmatpush3.bf16.msra.mxu1 %v4408_v28 }
  0xd9   : > { %4011 = vmatprep.subr.bf16.mxu1 %v4409_v0 }
  0xdb   : > { %2633 = vmatmul.mubr.bf16.gmra.mrb[84].mxu0 %v4421_v29  ;;  %3980 = vmatmul.mubr.bf16.gmra.mrb[84].mxu1 %v4965_v43 }
  0xdc   : > { %2640 = vmatprep.mubr.bf16.mxu0 %v4746_v55  ;;  %3983 = vmatprep.mubr.bf16.mxu1 %v4980_v59  ;;  %v4413_v55 = vld [vmem:[%s5509_s2 + $0x230] sm:$0xff]  }
  0xdd   : > { %4012 = vmatpush3.bf16.msra.mxu1 %v4409_v0 }
  0xde   : > { %4013 = vmatprep.subr.bf16.mxu1 %v4410_v30 }
  0xe1   : > { %4014 = vmatpush3.bf16.msra.mxu1 %v4410_v30  ;;  %v4415_v30 = vld [vmem:[%s4737_s12 + $0xc] sm:$0xff]  }
  0xe2   : > { %4015 = vmatprep.subr.bf16.mxu1 %v4411_v60 }
  0xe3   : > { %2641 = vmatmul.mubr.bf16.gmra.mrb[88].mxu0 %v4422_v18  ;;  %3984 = vmatmul.mubr.bf16.gmra.mrb[88].mxu1 %v4991_v14 }
  0xe4   : > { %2648 = vmatprep.mubr.bf16.mxu0 %v4775_v24  ;;  %3987 = vmatprep.mubr.bf16.mxu1 %v5006_v37 }
  0xe5   : > { %4016 = vmatpush3.bf16.msra.mxu1 %v4411_v60 }
  0xe6   : > { %4017 = vmatprep.subr.bf16.mxu1 %v4412_v35 }
  0xe9   : > { %4018 = vmatpush3.bf16.msra.mxu1 %v4412_v35  ;;  %v922_v35 = vshll.u32 %v4415_v30, 16 }
  0xea   : > { %4019 = vmatprep.subr.bf16.mxu1 %v4413_v55 }
  0xeb   : > { %2649 = vmatmul.mubr.bf16.gmra.mrb[92].mxu0 %v4768_v17  ;;  %3988 = vmatmul.mubr.bf16.gmra.mrb[92].mxu1 %v5017_v46 }
  0xec   : > { %2656 = vmatprep.mubr.bf16.mxu0 %v4793_v16  ;;  %3991 = vmatprep.mubr.bf16.mxu1 %v5032_v12 }
  0xed   : > { %4020 = vmatpush3.bf16.msra.mxu1 %v4413_v55 }
  0xee   : > { %4021 = vmatprep.subr.bf16.mxu1 %v4414_v40 }
  0xf1   : > { %4022 = vmatpush3.bf16.msra.mxu1 %v4414_v40 }
  0xf3   : > { %2657 = vmatmul.mubr.bf16.gmra.mrb[96].mxu0 %v4786_v38  ;;  %3992 = vmatmul.mubr.bf16.gmra.mrb[0].mxu1 %v4616_v39 }
  0xf4   : > { %2664 = vmatprep.mubr.bf16.mxu0 %v4799_v58  ;;  %3995 = vmatprep.mubr.bf16.mxu1 %v4634_v47 }
  0xfb   : > { %2665 = vmatmul.mubr.bf16.gmra.mrb[100].mxu0 %v4810_v4  ;;  %3996 = vmatmul.mubr.bf16.gmra.mrb[4].mxu1 %v4661_v1 }
  0xfc   : > { %2672 = vmatprep.mubr.bf16.mxu0 %v4814_v34  ;;  %3999 = vmatprep.mubr.bf16.mxu1 %v4676_v9 }
 0x103   : > { %v3519_v17 = vpop.f32.mrb[0].mxu0  ;;  %2673 = vmatmul.mubr.bf16.gmra.mrb[104].mxu0 %v4822_v7  ;;  %4000 = vmatmul.mubr.bf16.gmra.mrb[8].mxu1 %v4702_v31 }
 0x104   : > { %v3520_v24 = vpop.f32.mrb[1].mxu0  ;;  %2680 = vmatprep.mubr.bf16.mxu0 %v4828_v25  ;;  %4003 = vmatprep.mubr.bf16.mxu1 %v4717_v13 }
 0x105   : > { %v5092_v16 = vadd.f32 %v3520_v24, %v3519_v17  ;;  %v3522_v41 = vpop.f32.mrb[2].mxu0 }
 0x106   : > { %v3523_v38 = vpop.f32.mrb[3].mxu0 }
 0x107   : > { %v5095_v44 = vadd.f32 %v3523_v38, %v3522_v41 }
 0x10b   : > { %v3525_v58 = vpop.f32.mrb[4].mxu0  ;;  %2681 = vmatmul.mubr.bf16.gmra.mrb[108].mxu0 %v4840_v33  ;;  %4004 = vmatmul.mubr.bf16.gmra.mrb[12].mxu1 %v4749_v56 }
 0x10c   : > { %v3526_v4 = vpop.f32.mrb[5].mxu0  ;;  %2688 = vmatprep.mubr.bf16.mxu0 %v4844_v36  ;;  %4023 = vmatprep.mubr.bf16.mxu1 %v4954_v10 }
 0x10d   : > { %v5101_v34 = vadd.f32 %v3526_v4, %v3525_v58  ;;  %v3528_v45 = vpop.f32.mrb[6].mxu0  ;;  %v920_v4 = vshrl.u32 %v4415_v30, 16 }
 0x10e   : > { %v3529_v50 = vpop.f32.mrb[7].mxu0 }
 0x10f   : > { %v5103_v51 = vadd.f32 %v3529_v50, %v3528_v45 }
 0x113   : > { %v3531_v7 = vpop.f32.mrb[8].mxu0  ;;  %2689 = vmatmul.mubr.bf16.gmra.mrb[112].mxu0 %v4855_v48  ;;  %4024 = vmatmul.mubr.bf16.vlgmr.msra.gmra.mrb[80].mxu1 %v4965_v43 }
 0x114   : > { %v3532_v25 = vpop.f32.mrb[9].mxu0  ;;  %2696 = vmatprep.mubr.bf16.mxu0 %v4859_v53  ;;  %4027 = vmatprep.mubr.bf16.mxu1 %v4980_v59 }
 0x115   : > { %v5109_v49 = vadd.f32 %v3532_v25, %v3531_v7  ;;  %v3534_v54 = vpop.f32.mrb[10].mxu0 }
 0x116   : > { %v3535_v19 = vpop.f32.mrb[11].mxu0 }
 0x117   : > { %v5112_v2 = vadd.f32 %v3535_v19, %v3534_v54 }
 0x11b   : > { %2697 = vmatmul.mubr.bf16.gmra.mrb[116].mxu0 %v4870_v61  ;;  %4028 = vmatmul.mubr.bf16.gmra.mrb[84].mxu1 %v4991_v14 }
 0x11c   : > { %2704 = vmatprep.mubr.bf16.mxu0 %v4876_v5  ;;  %4031 = vmatprep.mubr.bf16.mxu1 %v5006_v37 }
 0x11e   : > { %v3537_v33 = vpop.f32.mrb[12].mxu0 }
 0x11f   : > { %v3538_v36 = vpop.f32.mrb[13].mxu0 }
 0x120   : > { %v5120_v10 = vadd.f32 %v3538_v36, %v3537_v33  ;;  %v3540_v48 = vpop.f32.mrb[14].mxu0 }
 0x121   : > { %v3541_v6 = vpop.f32.mrb[15].mxu0 }
 0x122   : > { %v5123_v11 = vadd.f32 %v3541_v6, %v3540_v48 }
 0x123   : > { %2705 = vmatmul.mubr.bf16.gmra.mrb[120].mxu0 %v4885_v22  ;;  %4032 = vmatmul.mubr.bf16.gmra.mrb[88].mxu1 %v5017_v46 }
 0x124   : > { %2712 = vmatprep.mubr.bf16.mxu0 %v4889_v21  ;;  %4035 = vmatprep.mubr.bf16.mxu1 %v5032_v12 }
 0x126   : > { %v3543_v53 = vpop.f32.mrb[16].mxu0  ;;  %v3655_v59 = vpop.f32.mrb[16].mxu1 }
 0x127   : > { %v3544_v61 = vpop.f32.mrb[17].mxu0  ;;  %v3656_v15 = vpop.f32.mrb[17].mxu1 }
 0x128   : > { %v5129_v5 = vadd.f32 %v3544_v61, %v3543_v53  ;;  %v3546_v43 = vpop.f32.mrb[18].mxu0  ;;  %v5133_v37 = vadd.f32 %v3656_v15, %v3655_v59  ;;  %v3658_v22 = vpop.f32.mrb[18].mxu1  ;;  %v4418_v59 = vld [vmem:[%s4737_s12 + $0xc] sm:$0xfe]  }
 0x129   : > { %v3547_v14 = vpop.f32.mrb[19].mxu0  ;;  %v3659_v26 = vpop.f32.mrb[19].mxu1 }
 0x12a   : > { %v5131_v20 = vadd.f32 %v3547_v14, %v3546_v43  ;;  %v5136_v21 = vadd.f32 %v3659_v26, %v3658_v22  ;;  %v4419_v14 = vld [vmem:[%s4737_s12 + $0x14] ss:$0 sps:$4 sm:$0x11]   ;;  %v1217_v26 = vrot.slane %v4418_v59, 1 }
 0x12b   : > { %2713 = vmatmul.mubr.bf16.gmra.mrb[124].mxu0 %v4897_v32  ;;  %4036 = vmatmul.mubr.bf16.gmra.mrb[92].mxu1 %v4616_v39 }
 0x12c   : > { %2720 = vmatprep.mubr.bf16.mxu0 %v4901_v23  ;;  %4039 = vmatprep.mubr.bf16.mxu1 %v4634_v47  ;;  %v4416_v47 = vld [vmem:[%s4737_s12 + $0x14] ss:$0 sps:$4 sm:$0x11]  }
 0x12d   : > { %v927_v45 = vshll.u32 %v4416_v47, 16 }
 0x12e   : > { %v3549_v46 = vpop.f32.mrb[20].mxu0  ;;  %v3661_v28 = vpop.f32.mrb[20].mxu1 }
 0x12f   : > { %v3550_v12 = vpop.f32.mrb[21].mxu0  ;;  %v3662_v29 = vpop.f32.mrb[21].mxu1  ;;  %v929_v54 = vrot.slane %v927_v45, 1 }
 0x130   : > { %v5141_v57 = vadd.f32 %v3550_v12, %v3549_v46  ;;  %v3552_v27 = vpop.f32.mrb[22].mxu0  ;;  %v5146_v32 = vadd.f32 %v3662_v29, %v3661_v28  ;;  %v3664_v18 = vpop.f32.mrb[22].mxu1  ;;  %v1218_v46 = vrot.slane %v4419_v14, 1 }
 0x131   : > { %v3553_v0 = vpop.f32.mrb[23].mxu0  ;;  %v3665_v23 = vpop.f32.mrb[23].mxu1 }
 0x132   : > { %v5144_v60 = vadd.f32 %v3553_v0, %v3552_v27  ;;  %v5149_v39 = vadd.f32 %v3665_v23, %v3664_v18  ;;  %v4417_v27 = vld [vmem:[%s4737_s12 + $0xc] sm:$0xff]  }
 0x133   : > { %2721 = vmatmul.mubr.bf16.gmra.mrb[128].mxu0 %v4912_v42  ;;  %4040 = vmatmul.mubr.bf16.gmra.mrb[0].mxu1 %v4661_v1  ;;  %v924_v42 = vrot.slane %v922_v35, 1  ;;  %v1219_v35 = vsel %vm1111_vm1, %v1217_v26, %v1218_v46 }
 0x134   : > { %2728 = vmatprep.mubr.bf16.mxu0 %v4915_v52  ;;  %4043 = vmatprep.mubr.bf16.mxu1 %v4676_v9 }
 0x135   : > { %v925_v9 = vor.u32 %v924_v42, %v920_v4 }
 0x136   : > { %v3555_v55 = vpop.f32.mrb[24].mxu0  ;;  %v3667_v41 = vpop.f32.mrb[24].mxu1 }
 0x137   : > { %v3556_v40 = vpop.f32.mrb[25].mxu0  ;;  %v3668_v58 = vpop.f32.mrb[25].mxu1  ;;  %v930_v61 = vsel %vm660_vm0, %v925_v9, %v929_v54 }
 0x138   : > { %v5155_v17 = vadd.f32 %v3556_v40, %v3555_v55  ;;  %v3558_v24 = vpop.f32.mrb[26].mxu0  ;;  %v5159_v52 = vadd.f32 %v3668_v58, %v3667_v41  ;;  %v3670_v1 = vpop.f32.mrb[26].mxu1 }
 0x139   : > { %v3559_v38 = vpop.f32.mrb[27].mxu0  ;;  %v3671_v7 = vpop.f32.mrb[27].mxu1 }
 0x13a   : > { %v5157_v50 = vadd.f32 %v3559_v38, %v3558_v24  ;;  %v5162_v25 = vadd.f32 %v3671_v7, %v3670_v1 }
 0x13b   : > { %2729 = vmatmul.mubr.bf16.gmra.mrb[132].mxu0 %v4927_v62  ;;  %4044 = vmatmul.mubr.bf16.gmra.mrb[4].mxu1 %v4702_v31 }
 0x13c   : > { %2736 = vmatprep.mubr.bf16.mxu0 %v4932_v3  ;;  %4047 = vmatprep.mubr.bf16.mxu1 %v4717_v13 }
 0x13e   : > { %v3561_v19 = vpop.f32.mrb[28].mxu0  ;;  %v3673_v6 = vpop.f32.mrb[28].mxu1 }
 0x13f   : > { %v3562_v33 = vpop.f32.mrb[29].mxu0  ;;  %v3674_v62 = vpop.f32.mrb[29].mxu1 }
 0x140   : > { %v5167_v36 = vadd.f32 %v3562_v33, %v3561_v19  ;;  %v3564_v48 = vpop.f32.mrb[30].mxu0  ;;  %v5172_v43 = vadd.f32 %v3674_v62, %v3673_v6  ;;  %v3676_v31 = vpop.f32.mrb[30].mxu1 }
 0x141   : > { %v3565_v53 = vpop.f32.mrb[31].mxu0  ;;  %v3677_v15 = vpop.f32.mrb[31].mxu1 }
 0x142   : > { %v5170_v3 = vadd.f32 %v3565_v53, %v3564_v48  ;;  %v5177_v13 = vadd.f32 %v3677_v15, %v3676_v31 }
 0x143   : > { %2737 = vmatmul.mubr.bf16.gmra.mrb[136].mxu0 %v4939_v8  ;;  %4048 = vmatmul.mubr.bf16.gmra.mrb[8].mxu1 %v4749_v56 }
 0x144   : > { %2744 = vmatprep.mubr.bf16.mxu0 %v930_v61  ;;  %4051 = vmatprep.mubr.bf16.mxu1 %v4762_v63 }
 0x146   : > { %v3567_v22 = vpop.f32.mrb[32].mxu0  ;;  %v3679_v29 = vpop.f32.mrb[32].mxu1 }
 0x147   : > { %v3568_v12 = vpop.f32.mrb[33].mxu0  ;;  %v3680_v18 = vpop.f32.mrb[33].mxu1 }
 0x148   : > { %v3569_v28 = vadd.f32 %v3568_v12, %v3567_v22  ;;  %v3570_v0 = vpop.f32.mrb[34].mxu0  ;;  %v5182_v47 = vadd.f32 %v3680_v18, %v3679_v29  ;;  %v3682_v8 = vpop.f32.mrb[34].mxu1 }
 0x149   : > { %v3571_v30 = vpop.f32.mrb[35].mxu0  ;;  %v3683_v55 = vpop.f32.mrb[35].mxu1 }
 0x14a   : > { %v3572_v23 = vadd.f32 %v3571_v30, %v3570_v0  ;;  %v5185_v56 = vadd.f32 %v3683_v55, %v3682_v8 }
 0x14b   : > { %2745 = vmatmul.mubr.bf16.gmra.mrb[140].mxu0 %v4417_v27  ;;  %4052 = vmatmul.mubr.bf16.gmra.mrb[12].mxu1 %v1219_v35 }
 0x14e   : > { %v3573_v63 = vpop.f32.mrb[36].mxu0  ;;  %v3685_v38 = vpop.f32.mrb[36].mxu1 }
 0x14f   : > { %v3574_v40 = vpop.f32.mrb[37].mxu0  ;;  %v3686_v4 = vpop.f32.mrb[37].mxu1 }
 0x150   : > { %v3575_v24 = vadd.f32 %v3574_v40, %v3573_v63  ;;  %v3576_v41 = vpop.f32.mrb[38].mxu0  ;;  %v5187_v45 = vadd.f32 %v3686_v4, %v3685_v38  ;;  %v3688_v1 = vpop.f32.mrb[38].mxu1 }
 0x151   : > { %v3577_v58 = vpop.f32.mrb[39].mxu0  ;;  %v3689_v7 = vpop.f32.mrb[39].mxu1 }
 0x152   : > { %v3578_v42 = vadd.f32 %v3577_v58, %v3576_v41  ;;  %v5189_v9 = vadd.f32 %v3689_v7, %v3688_v1 }
 0x156   : > { %v3579_v54 = vpop.f32.mrb[40].mxu0  ;;  %v3691_v6 = vpop.f32.mrb[40].mxu1 }
 0x157   : > { %v3580_v19 = vpop.f32.mrb[41].mxu0  ;;  %v3692_v62 = vpop.f32.mrb[41].mxu1 }
 0x158   : > { %v3581_v33 = vadd.f32 %v3580_v19, %v3579_v54  ;;  %v3582_v48 = vpop.f32.mrb[42].mxu0  ;;  %v5191_v31 = vadd.f32 %v3692_v62, %v3691_v6  ;;  %v3694_v59 = vpop.f32.mrb[42].mxu1 }
 0x159   : > { %v3583_v53 = vpop.f32.mrb[43].mxu0  ;;  %v3695_v14 = vpop.f32.mrb[43].mxu1 }
 0x15a   : > { %v3584_v61 = vadd.f32 %v3583_v53, %v3582_v48  ;;  %v5193_v15 = vadd.f32 %v3695_v14, %v3694_v59 }
 0x15e   : > { %v3585_v22 = vpop.f32.mrb[44].mxu0  ;;  %v3697_v27 = vpop.f32.mrb[44].mxu1 }
 0x15f   : > { %v3586_v26 = vpop.f32.mrb[45].mxu0  ;;  %v3698_v29 = vpop.f32.mrb[45].mxu1 }
 0x160   : > { %v5195_v46 = vadd.f32 %v3586_v26, %v3585_v22  ;;  %v3588_v12 = vpop.f32.mrb[46].mxu0  ;;  %v5197_v18 = vadd.f32 %v3698_v29, %v3697_v27  ;;  %v3700_v8 = vpop.f32.mrb[46].mxu1 }
 0x161   : > { %v3589_v0 = vpop.f32.mrb[47].mxu0  ;;  %v3701_v35 = vpop.f32.mrb[47].mxu1 }
 0x162   : > { %v3590_v30 = vadd.f32 %v3589_v0, %v3588_v12  ;;  %v5199_v55 = vadd.f32 %v3701_v35, %v3700_v8 }
 0x166   : > { %v3591_v63 = vpop.f32.mrb[48].mxu0  ;;  %v3703_v41 = vpop.f32.mrb[48].mxu1 }
 0x167   : > { %v3592_v40 = vpop.f32.mrb[49].mxu0  ;;  %v3704_v4 = vpop.f32.mrb[49].mxu1 }
 0x168   : > { %v5201_v38 = vadd.f32 %v3592_v40, %v3591_v63  ;;  %v3594_v58 = vpop.f32.mrb[50].mxu0  ;;  %v3705_v7 = vadd.f32 %v3704_v4, %v3703_v41  ;;  %v3706_v54 = vpop.f32.mrb[50].mxu1 }
 0x169   : > { %v3595_v1 = vpop.f32.mrb[51].mxu0  ;;  %v3707_v48 = vpop.f32.mrb[51].mxu1 }
 0x16a   : > { %v5203_v19 = vadd.f32 %v3595_v1, %v3594_v58  ;;  %v5205_v6 = vadd.f32 %v3705_v7, %v3569_v28  ;;  %v3708_v53 = vadd.f32 %v3707_v48, %v3706_v54 }
 0x16c   : > { %v5207_v62 = vadd.f32 %v3708_v53, %v3572_v23 }
 0x16e   : > { %v3597_v59 = vpop.f32.mrb[52].mxu0  ;;  %v3709_v22 = vpop.f32.mrb[52].mxu1 }
 0x16f   : > { %v3598_v14 = vpop.f32.mrb[53].mxu0  ;;  %v3710_v27 = vpop.f32.mrb[53].mxu1 }
 0x170   : > { %v5209_v26 = vadd.f32 %v3598_v14, %v3597_v59  ;;  %v3600_v12 = vpop.f32.mrb[54].mxu0  ;;  %v3711_v29 = vadd.f32 %v3710_v27, %v3709_v22  ;;  %v3712_v8 = vpop.f32.mrb[54].mxu1 }
 0x171   : > { %v3601_v0 = vpop.f32.mrb[55].mxu0  ;;  %v3713_v63 = vpop.f32.mrb[55].mxu1 }
 0x172   : > { %v5211_v35 = vadd.f32 %v3601_v0, %v3600_v12  ;;  %v5213_v40 = vadd.f32 %v3711_v29, %v3575_v24  ;;  %v3714_v28 = vadd.f32 %v3713_v63, %v3712_v8 }
 0x174   : > { %v5215_v41 = vadd.f32 %v3714_v28, %v3578_v42 }
 0x176   : > { %5512 = vst [vmem:[#allocation3_spill] sm:$0xff] %v5215_v41  ;;  %v3603_v23 = vpop.f32.mrb[56].mxu0  ;;  %v3715_v4 = vpop.f32.mrb[56].mxu1 }
 0x177   : > { %v3604_v58 = vpop.f32.mrb[57].mxu0  ;;  %v3716_v54 = vpop.f32.mrb[57].mxu1 }
 0x178   : > { %v5217_v1 = vadd.f32 %v3604_v58, %v3603_v23  ;;  %v3606_v7 = vpop.f32.mrb[58].mxu0  ;;  %v3717_v53 = vadd.f32 %v3716_v54, %v3715_v4  ;;  %v3718_v59 = vpop.f32.mrb[58].mxu1 }
 0x179   : > { %v3607_v48 = vpop.f32.mrb[59].mxu0  ;;  %v3719_v22 = vpop.f32.mrb[59].mxu1 }
 0x17a   : > { %v5219_v14 = vadd.f32 %v3607_v48, %v3606_v7  ;;  %v5221_v12 = vadd.f32 %v3717_v53, %v3581_v33  ;;  %v3720_v24 = vadd.f32 %v3719_v22, %v3718_v59 }
 0x17c   : > { %v5223_v27 = vadd.f32 %v3720_v24, %v3584_v61 }
 0x17e   : > { %v3609_v42 = vpop.f32.mrb[60].mxu0  ;;  %v3721_v29 = vpop.f32.mrb[60].mxu1 }
 0x17f   : > { %v3610_v0 = vpop.f32.mrb[61].mxu0  ;;  %v3722_v28 = vpop.f32.mrb[61].mxu1 }
 0x180   : > { %v5225_v8 = vadd.f32 %v3610_v0, %v3609_v42  ;;  %v3612_v63 = vpop.f32.mrb[62].mxu0  ;;  %v3723_v58 = vadd.f32 %v3722_v28, %v3721_v29  ;;  %v3724_v41 = vpop.f32.mrb[62].mxu1 }
 0x181   : > { %v3613_v23 = vpop.f32.mrb[63].mxu0  ;;  %v3725_v7 = vpop.f32.mrb[63].mxu1 }
 0x182   : > { %v5227_v4 = vadd.f32 %v3613_v23, %v3612_v63  ;;  %v5230_v54 = vadd.f32 %v3723_v58, %v5195_v46  ;;  %v3726_v33 = vadd.f32 %v3725_v7, %v3724_v41 }
 0x184   : > { %v5232_v48 = vadd.f32 %v3726_v33, %v3590_v30 }
 0x186   : > { %v3929_v61 = vpop.f32.mrb[64].mxu0  ;;  %v3727_v22 = vpop.f32.mrb[64].mxu1 }
 0x187   : > { %v1766_v53 = vadd.f32 %v3929_v61, %v5101_v34  ;;  %v1757_v59 = vpop.f32.mrb[65].mxu0  ;;  %v3728_v29 = vpop.f32.mrb[65].mxu1 }
 0x188   : > { %v1758_v24 = vadd.f32 %v5092_v16, %v1757_v59  ;;  %v3930_v42 = vpop.f32.mrb[66].mxu0  ;;  %v3729_v30 = vadd.f32 %v3728_v29, %v3727_v22  ;;  %v3730_v41 = vpop.f32.mrb[66].mxu1 }
 0x189   : > { %v5237_v0 = vadd.f32 %v5146_v32, %v1766_v53  ;;  %v1769_v63 = vadd.f32 %v3930_v42, %v5103_v51  ;;  %v1760_v28 = vpop.f32.mrb[67].mxu0  ;;  %v3731_v58 = vpop.f32.mrb[67].mxu1 }
 0x18a   : > { %v5241_v46 = vadd.f32 %v5133_v37, %v1758_v24  ;;  %v1761_v23 = vadd.f32 %v5095_v44, %v1760_v28  ;;  %v5248_v16 = vadd.f32 %v3729_v30, %v5201_v38  ;;  %v3732_v7 = vadd.f32 %v3731_v58, %v3730_v41 }
 0x18b   : > { %v5245_v34 = vadd.f32 %v5149_v39, %v1769_v63 }
 0x18c   : > { %v5251_v32 = vadd.f32 %v5136_v21, %v1761_v23  ;;  %v5254_v51 = vadd.f32 %v3732_v7, %v5203_v19 }
 0x18e   : > { %v3933_v37 = vpop.f32.mrb[68].mxu0  ;;  %v3733_v53 = vpop.f32.mrb[68].mxu1 }
 0x18f   : > { %v1782_v33 = vadd.f32 %v3933_v37, %v5120_v10  ;;  %v1773_v61 = vpop.f32.mrb[69].mxu0  ;;  %v3734_v38 = vpop.f32.mrb[69].mxu1 }
 0x190   : > { %v1774_v44 = vadd.f32 %v5109_v49, %v1773_v61  ;;  %v3934_v39 = vpop.f32.mrb[70].mxu0  ;;  %v3735_v19 = vadd.f32 %v3734_v38, %v3733_v53  ;;  %v3736_v42 = vpop.f32.mrb[70].mxu1 }
 0x191   : > { %v5259_v59 = vadd.f32 %v5172_v43, %v1782_v33  ;;  %v1785_v22 = vadd.f32 %v3934_v39, %v5123_v11  ;;  %v1776_v21 = vpop.f32.mrb[71].mxu0  ;;  %v3737_v63 = vpop.f32.mrb[71].mxu1 }
 0x192   : > { %v5263_v24 = vadd.f32 %v5159_v52, %v1774_v44  ;;  %v1777_v29 = vadd.f32 %v5112_v2, %v1776_v21  ;;  %v5270_v49 = vadd.f32 %v3735_v19, %v5209_v26  ;;  %v3738_v28 = vadd.f32 %v3737_v63, %v3736_v42 }
 0x193   : > { %v5267_v10 = vadd.f32 %v5177_v13, %v1785_v22 }
 0x194   : > { %v5273_v43 = vadd.f32 %v5162_v25, %v1777_v29  ;;  %v5276_v11 = vadd.f32 %v3738_v28, %v5211_v35 }
 0x196   : > { %v3937_v52 = vpop.f32.mrb[72].mxu0  ;;  %v3739_v23 = vpop.f32.mrb[72].mxu1 }
 0x197   : > { %v1798_v30 = vadd.f32 %v3937_v52, %v5141_v57  ;;  %v1789_v41 = vpop.f32.mrb[73].mxu0  ;;  %v3740_v26 = vpop.f32.mrb[73].mxu1 }
 0x198   : > { %v1790_v2 = vadd.f32 %v5129_v5, %v1789_v41  ;;  %v3938_v13 = vpop.f32.mrb[74].mxu0  ;;  %v3741_v35 = vadd.f32 %v3740_v26, %v3739_v23  ;;  %v3742_v33 = vpop.f32.mrb[74].mxu1 }
 0x199   : > { %v5281_v58 = vadd.f32 %v5187_v45, %v1798_v30  ;;  %v1801_v7 = vadd.f32 %v3938_v13, %v5144_v60  ;;  %v1792_v25 = vpop.f32.mrb[75].mxu0  ;;  %v3743_v53 = vpop.f32.mrb[75].mxu1 }
 0x19a   : > { %v5285_v37 = vadd.f32 %v5182_v47, %v1790_v2  ;;  %v1793_v61 = vadd.f32 %v5131_v20, %v1792_v25  ;;  %v5292_v5 = vadd.f32 %v3741_v35, %v5217_v1  ;;  %v3744_v44 = vadd.f32 %v3743_v53, %v3742_v33 }
 0x19b   : > { %v5289_v57 = vadd.f32 %v5189_v9, %v1801_v7 }
 0x19c   : > { %v2098_v45 = vadd.f32 %v5185_v56, %v1793_v61  ;;  %v5296_v60 = vadd.f32 %v3744_v44, %v5219_v14 }
 0x19e   : > { %v3941_v39 = vpop.f32.mrb[76].mxu0  ;;  %v3745_v22 = vpop.f32.mrb[76].mxu1 }
 0x19f   : > { %v1814_v47 = vadd.f32 %v3941_v39, %v5167_v36  ;;  %v1805_v38 = vpop.f32.mrb[77].mxu0  ;;  %v3746_v19 = vpop.f32.mrb[77].mxu1 }
 0x1a0   : > { %v1806_v20 = vadd.f32 %v5155_v17, %v1805_v38  ;;  %v3942_v21 = vpop.f32.mrb[78].mxu0  ;;  %v3747_v14 = vadd.f32 %v3746_v19, %v3745_v22  ;;  %v3748_v29 = vpop.f32.mrb[78].mxu1 }
 0x1a1   : > { %v5301_v9 = vadd.f32 %v5197_v18, %v1814_v47  ;;  %v1817_v1 = vadd.f32 %v3942_v21, %v5170_v3  ;;  %v1808_v42 = vpop.f32.mrb[79].mxu0  ;;  %v3749_v28 = vpop.f32.mrb[79].mxu1 }
 0x1a2   : > { %v5305_v56 = vadd.f32 %v5191_v31, %v1806_v20  ;;  %v1809_v63 = vadd.f32 %v5157_v50, %v1808_v42  ;;  %v5312_v17 = vadd.f32 %v3747_v14, %v5225_v8  ;;  %v3750_v52 = vadd.f32 %v3749_v28, %v3748_v29 }
 0x1a3   : > { %v5309_v36 = vadd.f32 %v5199_v55, %v1817_v1 }
 0x1a4   : > { %v2114_v18 = vadd.f32 %v5193_v15, %v1809_v63  ;;  %v5316_v3 = vadd.f32 %v3750_v52, %v5227_v4 }
 0x1a6   : > { %v3791_v30 = vpop.f32.mrb[80].mxu0 }
 0x1a7   : > { %v3792_v31 = vpop.f32.mrb[81].mxu0 }
 0x1a8   : > { %v3793_v41 = vadd.f32 %v3792_v31, %v3791_v30  ;;  %v3794_v23 = vpop.f32.mrb[82].mxu0 }
 0x1a9   : > { %v3795_v2 = vpop.f32.mrb[83].mxu0 }
 0x1aa   : > { %v3796_v13 = vadd.f32 %v3795_v2, %v3794_v23  ;;  %v5319_v50 = vadd.f32 %v3793_v41, %v5241_v46 }
 0x1ac   : > { %v5322_v55 = vadd.f32 %v3796_v13, %v5251_v32 }
 0x1ae   : > { %v3797_v8 = vpop.f32.mrb[84].mxu0 }
 0x1af   : > { %v3798_v26 = vpop.f32.mrb[85].mxu0 }
 0x1b0   : > { %v3799_v7 = vadd.f32 %v3798_v26, %v3797_v8  ;;  %v3800_v15 = vpop.f32.mrb[86].mxu0 }
 0x1b1   : > { %v3801_v25 = vpop.f32.mrb[87].mxu0 }
 0x1b2   : > { %v3802_v35 = vadd.f32 %v3801_v25, %v3800_v15  ;;  %v4073_v4 = vadd.f32 %v3799_v7, %v5237_v0 }
 0x1b4   : > { %v5326_v33 = vadd.f32 %v3802_v35, %v5245_v34 }
 0x1b6   : > { %v3803_v61 = vpop.f32.mrb[88].mxu0 }
 0x1b7   : > { %v3804_v53 = vpop.f32.mrb[89].mxu0 }
 0x1b8   : > { %v3805_v44 = vadd.f32 %v3804_v53, %v3803_v61  ;;  %v3806_v39 = vpop.f32.mrb[90].mxu0 }
 0x1b9   : > { %v3807_v46 = vpop.f32.mrb[91].mxu0 }
 0x1ba   : > { %v3808_v47 = vadd.f32 %v3807_v46, %v3806_v39  ;;  %v5329_v32 = vadd.f32 %v3805_v44, %v5263_v24 }
 0x1bc   : > { %v5332_v38 = vadd.f32 %v3808_v47, %v5273_v43 }
 0x1be   : > { %v3809_v22 = vpop.f32.mrb[92].mxu0 }
 0x1bf   : > { %v3810_v20 = vpop.f32.mrb[93].mxu0 }
 0x1c0   : > { %v3811_v21 = vadd.f32 %v3810_v20, %v3809_v22  ;;  %v3812_v19 = vpop.f32.mrb[94].mxu0 }
 0x1c1   : > { %v3813_v0 = vpop.f32.mrb[95].mxu0 }
 0x1c2   : > { %v3814_v1 = vadd.f32 %v3813_v0, %v3812_v19  ;;  %v5335_v34 = vadd.f32 %v3811_v21, %v5259_v59 }
 0x1c4   : > { %v5338_v42 = vadd.f32 %v3814_v1, %v5267_v10 }
 0x1c6   : > { %v3815_v14 = vpop.f32.mrb[96].mxu0 }
 0x1c7   : > { %v3816_v29 = vpop.f32.mrb[97].mxu0 }
 0x1c8   : > { %v3817_v63 = vadd.f32 %v3816_v29, %v3815_v14  ;;  %v3818_v24 = vpop.f32.mrb[98].mxu0 }
 0x1c9   : > { %v3819_v28 = vpop.f32.mrb[99].mxu0 }
 0x1ca   : > { %v3820_v52 = vadd.f32 %v3819_v28, %v3818_v24  ;;  %v5341_v43 = vadd.f32 %v3817_v63, %v5285_v37 }
 0x1cc   : > { %v5343_v30 = vadd.f32 %v3820_v52, %v2098_v45 }
 0x1ce   : > { %v3821_v31 = vpop.f32.mrb[100].mxu0 }
 0x1cf   : > { %v3822_v41 = vpop.f32.mrb[101].mxu0 }
 0x1d0   : > { %v3823_v23 = vadd.f32 %v3822_v41, %v3821_v31  ;;  %v3824_v2 = vpop.f32.mrb[102].mxu0 }
 0x1d1   : > { %v3825_v59 = vpop.f32.mrb[103].mxu0 }
 0x1d2   : > { %v3826_v13 = vadd.f32 %v3825_v59, %v3824_v2  ;;  %v5346_v10 = vadd.f32 %v3823_v23, %v5281_v58 }
 0x1d4   : > { %v5349_v8 = vadd.f32 %v3826_v13, %v5289_v57 }
 0x1d6   : > { %v3827_v26 = vpop.f32.mrb[104].mxu0 }
 0x1d7   : > { %v3828_v7 = vpop.f32.mrb[105].mxu0 }
 0x1d8   : > { %v3829_v15 = vadd.f32 %v3828_v7, %v3827_v26  ;;  %v3830_v25 = vpop.f32.mrb[106].mxu0 }
 0x1d9   : > { %v3831_v37 = vpop.f32.mrb[107].mxu0 }
 0x1da   : > { %v3832_v35 = vadd.f32 %v3831_v37, %v3830_v25  ;;  %v5352_v45 = vadd.f32 %v3829_v15, %v5305_v56  ;;  %v5365_v56 = vld [vmem:[%s5510_s3] ss:$0 sm:$0xff] }
 0x1dc   : > { %v5354_v61 = vadd.f32 %v3832_v35, %v2114_v18 }
 0x1de   : > { %v3833_v53 = vpop.f32.mrb[108].mxu0 }
 0x1df   : > { %v3834_v44 = vpop.f32.mrb[109].mxu0 }
 0x1e0   : > { %v3835_v39 = vadd.f32 %v3834_v44, %v3833_v53  ;;  %v3836_v58 = vpop.f32.mrb[110].mxu0 }
 0x1e1   : > { %v3837_v46 = vpop.f32.mrb[111].mxu0 }
 0x1e2   : > { %v3838_v47 = vadd.f32 %v3837_v46, %v3836_v58  ;;  %v5357_v57 = vadd.f32 %v3835_v39, %v5301_v9 }
 0x1e4   : > { %v5360_v22 = vadd.f32 %v3838_v47, %v5309_v36 }
 0x1e6   : > { %v3839_v20 = vpop.f32.mrb[112].mxu0  ;;  %v4025_v19 = vpop.f32.mrb[80].mxu1 }
 0x1e7   : > { %v3840_v21 = vpop.f32.mrb[113].mxu0  ;;  %v4074_v1 = vadd.f32 %v4073_v4, %v4025_v19  ;;  %v2787_v14 = vpop.f32.mrb[81].mxu1 }
 0x1e8   : > { %v3841_v18 = vadd.f32 %v3840_v21, %v3839_v20  ;;  %v3842_v0 = vpop.f32.mrb[114].mxu0  ;;  %v4078_v9 = vadd.f32 %v5319_v50, %v2787_v14  ;;  %v4026_v63 = vpop.f32.mrb[82].mxu1  ;;  %v5513_v14 = vld [vmem:[#allocation3_spill] sm:$0xff] }
 0x1e9   : > { %v3843_v29 = vpop.f32.mrb[115].mxu0  ;;  %v2955_v28 = vadd.f32 %v4074_v1, %v5365_v56  ;;  %v4082_v52 = vadd.f32 %v5326_v33, %v4026_v63  ;;  %v2790_v31 = vpop.f32.mrb[83].mxu1 }
 0x1ea   : > { %v3844_v24 = vadd.f32 %v3843_v29, %v3842_v0  ;;  %v5370_v36 = vadd.f32 %v5205_v6, %v3841_v18  ;;  %v2953_v41 = vadd.f32 %v4078_v9, %v5365_v56  ;;  %v4086_v23 = vadd.f32 %v5322_v55, %v2790_v31 }
 0x1eb   : > { %vm2987_vm2 = vcmp.ge.f32.partialorder %v2955_v28, 0.0  ;;  %v3019_v6 = vmul.f32 0.01, %v2955_v28  ;;  %v2956_v50 = vadd.f32 %v4082_v52, %v5365_v56 }
 0x1ec   : > { %v5377_v4 = vadd.f32 %v5207_v62, %v3844_v24  ;;  %vm2985_vm3 = vcmp.ge.f32.partialorder %v2953_v41, 0.0  ;;  %v3017_v33 = vmul.f32 0.01, %v2953_v41  ;;  %v2954_v2 = vadd.f32 %v4086_v23, %v5365_v56 }
 0x1ed   : > { %v3051_v55 = vsel %vm2987_vm2, %v2955_v28, %v3019_v6  ;;  %vm2988_vm4 = vcmp.ge.f32.partialorder %v2956_v50, 0.0  ;;  %v3020_v62 = vmul.f32 0.01, %v2956_v50 }
 0x1ee   : > { %v3845_v59 = vpop.f32.mrb[116].mxu0  ;;  %3083 = vst [vmem:[%s5382_s28 + $0x10] sm:$0xff] %v3051_v55  ;;  %v3049_v26 = vsel %vm2985_vm3, %v2953_v41, %v3017_v33  ;;  %vm2986_vm5 = vcmp.ge.f32.partialorder %v2954_v2, 0.0  ;;  %v3018_v7 = vmul.f32 0.01, %v2954_v2  ;;  %v4029_v15 = vpop.f32.mrb[84].mxu1 }
 0x1ef   : > { %v3846_v13 = vpop.f32.mrb[117].mxu0  ;;  %3081 = vst [vmem:[%s5382_s28] sm:$0xff] %v3049_v26  ;;  %v3052_v35 = vsel %vm2988_vm4, %v2956_v50, %v3020_v62  ;;  %v4090_v53 = vadd.f32 %v5335_v34, %v4029_v15  ;;  %v2803_v44 = vpop.f32.mrb[85].mxu1 }
 0x1f0   : > { %v3847_v25 = vadd.f32 %v3846_v13, %v3845_v59  ;;  %v3848_v37 = vpop.f32.mrb[118].mxu0  ;;  %3084 = vst [vmem:[%s5382_s28 + $0x18] sm:$0xff] %v3052_v35  ;;  %v3050_v58 = vsel %vm2986_vm5, %v2954_v2, %v3018_v7  ;;  %v4094_v46 = vadd.f32 %v5329_v32, %v2803_v44  ;;  %v4030_v47 = vpop.f32.mrb[86].mxu1 }
 0x1f1   : > { %v3849_v39 = vpop.f32.mrb[119].mxu0  ;;  %3082 = vst [vmem:[%s5382_s28 + $0x8] sm:$0xff] %v3050_v58  ;;  %v2959_v19 = vadd.f32 %v4090_v53, %v5365_v56  ;;  %v4098_v18 = vadd.f32 %v5338_v42, %v4030_v47  ;;  %v2806_v0 = vpop.f32.mrb[87].mxu1 }
 0x1f2   : > { %v3850_v20 = vadd.f32 %v3849_v39, %v3848_v37  ;;  %v5392_v21 = vadd.f32 %v5213_v40, %v3847_v25  ;;  %v2957_v34 = vadd.f32 %v4094_v46, %v5365_v56  ;;  %v4102_v1 = vadd.f32 %v5332_v38, %v2806_v0 }
 0x1f3   : > { %vm2991_vm6 = vcmp.ge.f32.partialorder %v2959_v19, 0.0  ;;  %v3023_v32 = vmul.f32 0.01, %v2959_v19  ;;  %v2960_v9 = vadd.f32 %v4098_v18, %v5365_v56 }
 0x1f4   : > { %v5400_v29 = vadd.f32 %v5513_v14, %v3850_v20  ;;  %vm2989_vm7 = vcmp.ge.f32.partialorder %v2957_v34, 0.0  ;;  %v3021_v40 = vmul.f32 0.01, %v2957_v34  ;;  %v2958_v63 = vadd.f32 %v4102_v1, %v5365_v56 }
 0x1f5   : > { %v3055_v42 = vsel %vm2991_vm6, %v2959_v19, %v3023_v32  ;;  %vm2992_vm8 = vcmp.ge.f32.partialorder %v2960_v9, 0.0  ;;  %v3024_v28 = vmul.f32 0.01, %v2960_v9 }
 0x1f6   : > { %v3851_v24 = vpop.f32.mrb[120].mxu0  ;;  %3087 = vst [vmem:[%s5382_s28 + $0x30] sm:$0xff] %v3055_v42  ;;  %v3053_v38 = vsel %vm2989_vm7, %v2957_v34, %v3021_v40  ;;  %vm2990_vm9 = vcmp.ge.f32.partialorder %v2958_v63, 0.0  ;;  %v3022_v31 = vmul.f32 0.01, %v2958_v63  ;;  %v4033_v41 = vpop.f32.mrb[88].mxu1 }
 0x1f7   : > { %v3852_v52 = vpop.f32.mrb[121].mxu0  ;;  %3085 = vst [vmem:[%s5382_s28 + $0x20] sm:$0xff] %v3053_v38  ;;  %v3056_v50 = vsel %vm2992_vm8, %v2960_v9, %v3024_v28  ;;  %v4106_v33 = vadd.f32 %v5346_v10, %v4033_v41  ;;  %v2819_v2 = vpop.f32.mrb[89].mxu1 }
 0x1f8   : > { %v3853_v23 = vadd.f32 %v3852_v52, %v3851_v24  ;;  %v3854_v6 = vpop.f32.mrb[122].mxu0  ;;  %3088 = vst [vmem:[%s5382_s28 + $0x38] sm:$0xff] %v3056_v50  ;;  %v3054_v55 = vsel %vm2990_vm9, %v2958_v63, %v3022_v31  ;;  %v4110_v62 = vadd.f32 %v5341_v43, %v2819_v2  ;;  %v4034_v13 = vpop.f32.mrb[90].mxu1 }
 0x1f9   : > { %v3855_v59 = vpop.f32.mrb[123].mxu0  ;;  %3086 = vst [vmem:[%s5382_s28 + $0x28] sm:$0xff] %v3054_v55  ;;  %v2963_v15 = vadd.f32 %v4106_v33, %v5365_v56  ;;  %v4114_v25 = vadd.f32 %v5349_v8, %v4034_v13  ;;  %v2822_v37 = vpop.f32.mrb[91].mxu1 }
 0x1fa   : > { %v3856_v26 = vadd.f32 %v3855_v59, %v3854_v6  ;;  %v5410_v7 = vadd.f32 %v5221_v12, %v3853_v23  ;;  %v2961_v10 = vadd.f32 %v4110_v62, %v5365_v56  ;;  %v4118_v35 = vadd.f32 %v5343_v30, %v2822_v37 }
 0x1fb   : > { %vm2995_vm10 = vcmp.ge.f32.partialorder %v2963_v15, 0.0  ;;  %v3027_v43 = vmul.f32 0.01, %v2963_v15  ;;  %v2964_v44 = vadd.f32 %v4114_v25, %v5365_v56 }
 0x1fc   : > { %v5418_v53 = vadd.f32 %v5223_v27, %v3856_v26  ;;  %vm2993_vm11 = vcmp.ge.f32.partialorder %v2961_v10, 0.0  ;;  %v3025_v12 = vmul.f32 0.01, %v2961_v10  ;;  %v2962_v39 = vadd.f32 %v4118_v35, %v5365_v56 }
 0x1fd   : > { %v3059_v8 = vsel %vm2995_vm10, %v2963_v15, %v3027_v43  ;;  %vm2996_vm12 = vcmp.ge.f32.partialorder %v2964_v44, 0.0  ;;  %v3028_v46 = vmul.f32 0.01, %v2964_v44 }
 0x1fe   : > { %v3857_v58 = vpop.f32.mrb[124].mxu0  ;;  %3091 = vst [vmem:[%s5382_s28 + $0x50] sm:$0xff] %v3059_v8  ;;  %v3057_v30 = vsel %vm2993_vm11, %v2961_v10, %v3025_v12  ;;  %vm2994_vm13 = vcmp.ge.f32.partialorder %v2962_v39, 0.0  ;;  %v3026_v27 = vmul.f32 0.01, %v2962_v39  ;;  %v4037_v20 = vpop.f32.mrb[92].mxu1 }
 0x1ff   : > { %v3858_v47 = vpop.f32.mrb[125].mxu0  ;;  %3089 = vst [vmem:[%s5382_s28 + $0x40] sm:$0xff] %v3057_v30  ;;  %v3060_v0 = vsel %vm2996_vm12, %v2964_v44, %v3028_v46  ;;  %v4122_v34 = vadd.f32 %v5357_v57, %v4037_v20  ;;  %v2835_v1 = vpop.f32.mrb[93].mxu1 }
 0x200   : > { %v3859_v19 = vadd.f32 %v3858_v47, %v3857_v58  ;;  %v3860_v18 = vpop.f32.mrb[126].mxu0  ;;  %3092 = vst [vmem:[%s5382_s28 + $0x58] sm:$0xff] %v3060_v0  ;;  %v3058_v32 = vsel %vm2994_vm13, %v2962_v39, %v3026_v27  ;;  %v4126_v9 = vadd.f32 %v5352_v45, %v2835_v1  ;;  %v4038_v40 = vpop.f32.mrb[94].mxu1 }
 0x201   : > { %v3861_v14 = vpop.f32.mrb[127].mxu0  ;;  %3090 = vst [vmem:[%s5382_s28 + $0x48] sm:$0xff] %v3058_v32  ;;  %v2967_v42 = vadd.f32 %v4122_v34, %v5365_v56  ;;  %v4130_v28 = vadd.f32 %v5360_v22, %v4038_v40  ;;  %v2838_v52 = vpop.f32.mrb[95].mxu1 }
 0x202   : > { %v3862_v63 = vadd.f32 %v3861_v14, %v3860_v18  ;;  %v5428_v24 = vadd.f32 %v5230_v54, %v3859_v19  ;;  %v2965_v57 = vadd.f32 %v4126_v9, %v5365_v56  ;;  %v4134_v38 = vadd.f32 %v5354_v61, %v2838_v52 }
 0x203   : > { %vm2999_vm14 = vcmp.ge.f32.partialorder %v2967_v42, 0.0  ;;  %v3031_v45 = vmul.f32 0.01, %v2967_v42  ;;  %v2968_v41 = vadd.f32 %v4130_v28, %v5365_v56 }
 0x204   : > { %v5436_v31 = vadd.f32 %v5232_v48, %v3862_v63  ;;  %vm2997_vm15 = vcmp.ge.f32.partialorder %v2965_v57, 0.0  ;;  %v3029_v54 = vmul.f32 0.01, %v2965_v57  ;;  %v2966_v23 = vadd.f32 %v4134_v38, %v5365_v56 }
 0x205   : > { %v3063_v22 = vsel %vm2999_vm14, %v2967_v42, %v3031_v45  ;;  %vm3000_vm0 = vcmp.ge.f32.partialorder %v2968_v41, 0.0  ;;  %v3032_v50 = vmul.f32 0.01, %v2968_v41 }
 0x206   : > { %v3863_v6 = vpop.f32.mrb[128].mxu0  ;;  %3095 = vst [vmem:[%s5382_s28 + $0x70] sm:$0xff] %v3063_v22  ;;  %v3061_v61 = vsel %vm2997_vm15, %v2965_v57, %v3029_v54  ;;  %vm2998_vm1 = vcmp.ge.f32.partialorder %v2966_v23, 0.0  ;;  %v3030_v48 = vmul.f32 0.01, %v2966_v23  ;;  %v4041_v2 = vpop.f32.mrb[0].mxu1 }
 0x207   : > { %v3864_v33 = vpop.f32.mrb[129].mxu0  ;;  %3093 = vst [vmem:[%s5382_s28 + $0x60] sm:$0xff] %v3061_v61  ;;  %v3064_v62 = vsel %vm3000_vm0, %v2968_v41, %v3032_v50  ;;  %v4137_v13 = vadd.f32 %v5392_v21, %v4041_v2  ;;  %v2851_v26 = vpop.f32.mrb[1].mxu1 }
 0x208   : > { %v3865_v59 = vadd.f32 %v3864_v33, %v3863_v6  ;;  %v3866_v55 = vpop.f32.mrb[130].mxu0  ;;  %3096 = vst [vmem:[%s5382_s28 + $0x78] sm:$0xff] %v3064_v62  ;;  %v3062_v25 = vsel %vm2998_vm1, %v2966_v23, %v3030_v48  ;;  %v4140_v37 = vadd.f32 %v5370_v36, %v2851_v26  ;;  %v4042_v10 = vpop.f32.mrb[2].mxu1 }
 0x209   : > { %v3867_v15 = vpop.f32.mrb[131].mxu0  ;;  %3094 = vst [vmem:[%s5382_s28 + $0x68] sm:$0xff] %v3062_v25  ;;  %v2971_v44 = vadd.f32 %v4137_v13, %v5365_v56  ;;  %v4143_v12 = vadd.f32 %v5400_v29, %v4042_v10  ;;  %v2854_v39 = vpop.f32.mrb[3].mxu1 }
 0x20a   : > { %v3868_v35 = vadd.f32 %v3867_v15, %v3866_v55  ;;  %v5446_v43 = vadd.f32 %v5248_v16, %v3865_v59  ;;  %v2969_v21 = vadd.f32 %v4140_v37, %v5365_v56  ;;  %v4146_v58 = vadd.f32 %v5377_v4, %v2854_v39 }
 0x20b   : > { %vm3003_vm2 = vcmp.ge.f32.partialorder %v2971_v44, 0.0  ;;  %v3035_v36 = vmul.f32 0.01, %v2971_v44  ;;  %v2972_v46 = vadd.f32 %v4143_v12, %v5365_v56 }
 0x20c   : > { %v5454_v8 = vadd.f32 %v5254_v51, %v3868_v35  ;;  %vm3001_vm3 = vcmp.ge.f32.partialorder %v2969_v21, 0.0  ;;  %v3033_v16 = vmul.f32 0.01, %v2969_v21  ;;  %v2970_v47 = vadd.f32 %v4146_v58, %v5365_v56 }
 0x20d   : > { %v3067_v29 = vsel %vm3003_vm2, %v2971_v44, %v3035_v36  ;;  %vm3004_vm4 = vcmp.ge.f32.partialorder %v2972_v46, 0.0  ;;  %v3036_v27 = vmul.f32 0.01, %v2972_v46 }
 0x20e   : > { %v3869_v30 = vpop.f32.mrb[132].mxu0  ;;  %3099 = vst [vmem:[%s5382_s28 + $0x90] sm:$0xff] %v3067_v29  ;;  %v3065_v4 = vsel %vm3001_vm3, %v2969_v21, %v3033_v16  ;;  %vm3002_vm5 = vcmp.ge.f32.partialorder %v2970_v47, 0.0  ;;  %v3034_v51 = vmul.f32 0.01, %v2970_v47  ;;  %v4045_v19 = vpop.f32.mrb[4].mxu1 }
 0x20f   : > { %v3870_v20 = vpop.f32.mrb[133].mxu0  ;;  %3097 = vst [vmem:[%s5382_s28 + $0x80] sm:$0xff] %v3065_v4  ;;  %v3068_v34 = vsel %vm3004_vm4, %v2972_v46, %v3036_v27  ;;  %v4149_v1 = vadd.f32 %v5428_v24, %v4045_v19  ;;  %v2867_v14 = vpop.f32.mrb[5].mxu1 }
 0x210   : > { %v3871_v18 = vadd.f32 %v3870_v20, %v3869_v30  ;;  %v3872_v0 = vpop.f32.mrb[134].mxu0  ;;  %3100 = vst [vmem:[%s5382_s28 + $0x98] sm:$0xff] %v3068_v34  ;;  %v3066_v9 = vsel %vm3002_vm5, %v2970_v47, %v3034_v51  ;;  %v4152_v40 = vadd.f32 %v5410_v7, %v2867_v14  ;;  %v4046_v63 = vpop.f32.mrb[6].mxu1 }
 0x211   : > { %v3873_v32 = vpop.f32.mrb[135].mxu0  ;;  %3098 = vst [vmem:[%s5382_s28 + $0x88] sm:$0xff] %v3066_v9  ;;  %v2975_v52 = vadd.f32 %v4149_v1, %v5365_v56  ;;  %v4155_v57 = vadd.f32 %v5436_v31, %v4046_v63  ;;  %v2870_v38 = vpop.f32.mrb[7].mxu1 }
 0x212   : > { %v3874_v42 = vadd.f32 %v3873_v32, %v3872_v0  ;;  %v4160_v28 = vadd.f32 %v5270_v49, %v3871_v18  ;;  %v2973_v45 = vadd.f32 %v4152_v40, %v5365_v56  ;;  %v4158_v24 = vadd.f32 %v5418_v53, %v2870_v38 }
 0x213   : > { %vm3007_vm6 = vcmp.ge.f32.partialorder %v2975_v52, 0.0  ;;  %v3039_v54 = vmul.f32 0.01, %v2975_v52  ;;  %v2976_v7 = vadd.f32 %v4155_v57, %v5365_v56 }
 0x214   : > { %v4166_v41 = vadd.f32 %v5276_v11, %v3874_v42  ;;  %vm3005_vm7 = vcmp.ge.f32.partialorder %v2973_v45, 0.0  ;;  %v3037_v49 = vmul.f32 0.01, %v2973_v45  ;;  %v2974_v23 = vadd.f32 %v4158_v24, %v5365_v56 }
 0x215   : > { %v3071_v22 = vsel %vm3007_vm6, %v2975_v52, %v3039_v54  ;;  %vm3008_vm8 = vcmp.ge.f32.partialorder %v2976_v7, 0.0  ;;  %v3040_v31 = vmul.f32 0.01, %v2976_v7 }
 0x216   : > { %v3875_v6 = vpop.f32.mrb[136].mxu0  ;;  %3103 = vst [vmem:[%s5382_s28 + $0xb0] sm:$0xff] %v3071_v22  ;;  %v3069_v33 = vsel %vm3005_vm7, %v2973_v45, %v3037_v49  ;;  %vm3006_vm9 = vcmp.ge.f32.partialorder %v2974_v23, 0.0  ;;  %v3038_v11 = vmul.f32 0.01, %v2974_v23  ;;  %v4049_v53 = vpop.f32.mrb[8].mxu1 }
 0x217   : > { %v3876_v50 = vpop.f32.mrb[137].mxu0  ;;  %3101 = vst [vmem:[%s5382_s28 + $0xa0] sm:$0xff] %v3069_v33  ;;  %v3072_v2 = vsel %vm3008_vm8, %v2976_v7, %v3040_v31  ;;  %v4161_v59 = vadd.f32 %v4160_v28, %v4049_v53  ;;  %v2883_v55 = vpop.f32.mrb[9].mxu1 }
 0x218   : > { %v3877_v61 = vadd.f32 %v3876_v50, %v3875_v6  ;;  %v3878_v48 = vpop.f32.mrb[138].mxu0  ;;  %3104 = vst [vmem:[%s5382_s28 + $0xb8] sm:$0xff] %v3072_v2  ;;  %v3070_v13 = vsel %vm3006_vm9, %v2974_v23, %v3038_v11  ;;  %v4164_v26 = vadd.f32 %v5446_v43, %v2883_v55  ;;  %v4050_v15 = vpop.f32.mrb[10].mxu1 }
 0x219   : > { %v3879_v62 = vpop.f32.mrb[139].mxu0  ;;  %3102 = vst [vmem:[%s5382_s28 + $0xa8] sm:$0xff] %v3070_v13  ;;  %v2979_v10 = vadd.f32 %v4161_v59, %v5365_v56  ;;  %v4167_v35 = vadd.f32 %v4166_v41, %v4050_v15  ;;  %v2886_v44 = vpop.f32.mrb[11].mxu1 }
 0x21a   : > { %v3880_v25 = vadd.f32 %v3879_v62, %v3878_v48  ;;  %v4175_v37 = vadd.f32 %v5292_v5, %v3877_v61  ;;  %v2977_v12 = vadd.f32 %v4164_v26, %v5365_v56  ;;  %v4170_v39 = vadd.f32 %v5454_v8, %v2886_v44 }
 0x21b   : > { %vm3011_vm10 = vcmp.ge.f32.partialorder %v2979_v10, 0.0  ;;  %v3043_v58 = vmul.f32 0.01, %v2979_v10  ;;  %v2980_v43 = vadd.f32 %v4167_v35, %v5365_v56 }
 0x21c   : > { %v4181_v21 = vadd.f32 %v5296_v60, %v3880_v25  ;;  %vm3009_vm11 = vcmp.ge.f32.partialorder %v2977_v12, 0.0  ;;  %v3041_v36 = vmul.f32 0.01, %v2977_v12  ;;  %v2978_v5 = vadd.f32 %v4170_v39, %v5365_v56 }
 0x21d   : > { %v3075_v16 = vsel %vm3011_vm10, %v2979_v10, %v3043_v58  ;;  %vm3012_vm12 = vcmp.ge.f32.partialorder %v2980_v43, 0.0  ;;  %v3044_v47 = vmul.f32 0.01, %v2980_v43 }
 0x21e   : > { %v3881_v46 = vpop.f32.mrb[140].mxu0  ;;  %3107 = vst [vmem:[%s5382_s28 + $0xd0] sm:$0xff] %v3075_v16  ;;  %v3073_v29 = vsel %vm3009_vm11, %v2977_v12, %v3041_v36  ;;  %vm3010_vm13 = vcmp.ge.f32.partialorder %v2978_v5, 0.0  ;;  %v3042_v60 = vmul.f32 0.01, %v2978_v5  ;;  %v4053_v8 = vpop.f32.mrb[12].mxu1 }
 0x21f   : > { %v3882_v30 = vpop.f32.mrb[141].mxu0  ;;  %3105 = vst [vmem:[%s5382_s28 + $0xc0] sm:$0xff] %v3073_v29  ;;  %v3076_v4 = vsel %vm3012_vm12, %v2980_v43, %v3044_v47  ;;  %v2899_v51 = vpop.f32.mrb[13].mxu1 }
 0x220   : > { %v3883_v27 = vadd.f32 %v3882_v30, %v3881_v46  ;;  %v3884_v20 = vpop.f32.mrb[142].mxu0  ;;  %3108 = vst [vmem:[%s5382_s28 + $0xd8] sm:$0xff] %v3076_v4  ;;  %v3074_v18 = vsel %vm3010_vm13, %v2978_v5, %v3042_v60  ;;  %v4176_v34 = vadd.f32 %v4175_v37, %v2899_v51  ;;  %v4054_v1 = vpop.f32.mrb[14].mxu1 }
 0x221   : > { %v3885_v19 = vpop.f32.mrb[143].mxu0  ;;  %3106 = vst [vmem:[%s5382_s28 + $0xc8] sm:$0xff] %v3074_v18  ;;  %v2902_v32 = vpop.f32.mrb[15].mxu1 }
 0x222   : > { %v4172_v0 = vadd.f32 %v5312_v17, %v3883_v27  ;;  %v3886_v14 = vadd.f32 %v3885_v19, %v3884_v20  ;;  %v2981_v40 = vadd.f32 %v4176_v34, %v5365_v56  ;;  %v4182_v42 = vadd.f32 %v4181_v21, %v2902_v32 }
 0x224   : > { %v4173_v9 = vadd.f32 %v4172_v0, %v4053_v8  ;;  %v4178_v63 = vadd.f32 %v5316_v3, %v3886_v14  ;;  %vm3013_vm14 = vcmp.ge.f32.partialorder %v2981_v40, 0.0  ;;  %v3045_v52 = vmul.f32 0.01, %v2981_v40 }
 0x225   : > { %v2982_v17 = vadd.f32 %v4182_v42, %v5365_v56 }
 0x226   : > { %v2983_v28 = vadd.f32 %v4173_v9, %v5365_v56  ;;  %v4179_v57 = vadd.f32 %v4178_v63, %v4054_v1  ;;  %v3077_v45 = vsel %vm3013_vm14, %v2981_v40, %v3045_v52 }
 0x227   : > { %3109 = vst [vmem:[%s5382_s28 + $0xe0] sm:$0xff] %v3077_v45  ;;  %vm3014_vm0 = vcmp.ge.f32.partialorder %v2982_v17, 0.0  ;;  %v3046_v41 = vmul.f32 0.01, %v2982_v17 }
 0x228   : > { %vm3015_vm15 = vcmp.ge.f32.partialorder %v2983_v28, 0.0  ;;  %v3047_v38 = vmul.f32 0.01, %v2983_v28  ;;  %v2984_v24 = vadd.f32 %v4179_v57, %v5365_v56 }
 0x229   : > { %v3078_v7 = vsel %vm3014_vm0, %v2982_v17, %v3046_v41 }
 0x22a   : > { %v3079_v3 = vsel %vm3015_vm15, %v2983_v28, %v3047_v38  ;;  %vm3016_vm1 = vcmp.ge.f32.partialorder %v2984_v24, 0.0  ;;  %v3048_v54 = vmul.f32 0.01, %v2984_v24  ;;  %3110 = vst [vmem:[%s5382_s28 + $0xe8] sm:$0xff] %v3078_v7 }
 0x22b   : > { %3111 = vst [vmem:[%s5382_s28 + $0xf0] sm:$0xff] %v3079_v3 }
 0x22c   : > { %v3080_v49 = vsel %vm3016_vm1, %v2984_v24, %v3048_v54 }
 0x22d   : > { %3112 = vst [vmem:[%s5382_s28 + $0xf8] sm:$0xff] %v3080_v49 }
 0x22e PF: > { %s14_s17 = sadd.s32 1, %s4445_s17   ;;  %s5514_s15 = smov %s4441_s16 }
 0x22f   : > { %p11_p5 = scmp.ge.s32.totalorder %s14_s17, 4   ;;  %s5515_s16 = smov %s5517_s18 }
 0x231   :  { %13 = sbr.rel (!%p11_p5) target bundleno = 2 (0x2), region = 74 }

</bundles_post_ra>
